<compile_context>
chip_gen: v7x
topology: tpu7x:2x2x1
jax: 0.10.0
libtpu: 0.0.40
codegen_flags: <defaults>
</compile_context>

<pallas_src>
from functools import partial

import jax
import jax.numpy as jnp
from jax.experimental import pallas as pl
from jax.experimental.pallas import tpu as pltpu


def _round_up(x, m):
    return ((x + m - 1) // m) * m


def _cdiv(a, b):
    return -(-a // b)


def _leaky_relu(x, slope=0.2):
    return jnp.where(x > 0, x, slope * x)


def discriminator_kernel(x_ref, w1_ref, b1_ref, w2_ref, b2_ref, w3_ref, b3_ref,
                         out_ref, acc_ref, *, feat, tk, mask_cols):
    """Grid = (batch_tiles, k_tiles).  Layer-1 partial sums accumulate into a
    f32 VMEM scratch across the K axis; the rest of the MLP runs on the last
    K step and stores a lane-dense (1, tm) score slab."""
    k = pl.program_id(1)

    # Fold the layer-1 bias into the accumulator init.
    @pl.when(k == 0)
    def _():
        acc_ref[...] = jnp.broadcast_to(b1_ref[...], acc_ref.shape)

    # Stream f32 image tile, mask the ragged feature tail (static no-op when
    # F is an exact multiple of tk), cast to bf16 on-chip for the MXU.
    x = x_ref[...]
    if mask_cols:
        col = k * tk + jax.lax.broadcasted_iota(jnp.int32, x.shape, 1)
        x = jnp.where(col < feat, x, 0.0)
    acc_ref[...] += jnp.dot(x.astype(jnp.bfloat16), w1_ref[...],
                            preferred_element_type=jnp.float32)

    @pl.when(k == pl.num_programs(1) - 1)
    def _():
        # Activations kept in f32 (v5e VPU has no bf16 ALU).
        h1 = _leaky_relu(acc_ref[...])                                    # (tm, 512) f32
        h2 = _leaky_relu(jnp.dot(h1.astype(jnp.bfloat16), w2_ref[...],
                                 preferred_element_type=jnp.float32)
                         + b2_ref[...])                                   # (tm, 256) f32
        # Final Linear(256, 1): (1,256) @ (256,tm) -> lane-dense (1, tm) row.
        score = jnp.dot(w3_ref[...], h2.astype(jnp.bfloat16).T,
                        preferred_element_type=jnp.float32) + b3_ref[0, 0]
        out_ref[...] = score.astype(out_ref.dtype)


def discriminator_forward(img, params):
    """img: (B, C, H, W) float32. Returns (B, 1) float32 scores."""
    w1, b1, w2, b2, w3_row, b3 = params
    B = img.shape[0]
    x = img.reshape(B, -1)                      # contiguous view; stays f32 (cast in-kernel)
    F = x.shape[1]
    assert w1.shape[0] == F, (w1.shape, F)
    H1, H2 = w1.shape[1], w2.shape[1]           # 512, 256

    # ---- batch tile: multiple of 16 (bf16 sublanes); multiple of 128 and
    # >= 2 tiles whenever B > 128 (lane-dense out blocks + v7x megacore). ----
    if B <= 128:
        tm = _round_up(B, 16)
    elif B <= 512:
        tm = 128
    elif B <= 2048:
        tm = 256
    else:
        tm = 512
    grid_m = _cdiv(B, tm)
    Bp_out = grid_m * tm

    # ---- feature (K) tile: largest multiple of 128 keeping the double
    # buffers of x (f32) + W1 (bf16) under ~20 MB; W1 fully resident for
    # typical WGAN feature counts. ----
    budget = 20 * (1 << 20)
    per_tk = 8 * tm + 4 * H1                    # 2*tm*4 (x) + 2*H1*2 (w1) per K row
    tk = max(128, min(_round_up(F, 128), (budget // per_tk) // 128 * 128))
    grid_k = _cdiv(F, tk)
    Kp = grid_k * tk
    mask_cols = Kp != F                         # ragged feature tail handled in-kernel

    # Only the (small) weight is padded; the big activation is never copied.
    if w1.shape[0] != Kp:
        w1 = jnp.pad(w1, ((0, Kp - w1.shape[0]), (0, 0)))

    # ---- VMEM budget / cost estimate ----
    vmem_need = (2 * tm * tk * 4                # x tiles, double-buffered, f32
                 + 2 * tk * H1 * 2              # w1 tiles, double-buffered, bf16
                 + 2 * H1 * H2 * 2              # w2 (resident)
                 + tm * H1 * 4                  # layer-1 f32 accumulator
                 + 2 * tm * 4                   # output block
                 + 2 * (H1 + 2 * H2) * 4)       # b1 / b2 / w3 row blocks
    vmem_limit = int(min(48 << 20, max(32 << 20, vmem_need + (4 << 20))))

    flops = 2 * B * F * H1 + 2 * B * H1 * H2 + 2 * B * H2
    bytes_accessed = (B * F * 4 + Kp * H1 * 2 + H1 * H2 * 2 + H2 * 2
                      + (H1 + H2) * 4 + 4 + Bp_out * 4)

    kernel = partial(discriminator_kernel, feat=F, tk=tk, mask_cols=mask_cols)

    out = pl.pallas_call(
        kernel,
        out_shape=jax.ShapeDtypeStruct((1, Bp_out), jnp.float32),
        grid_spec=pltpu.PrefetchScalarGridSpec(
            num_scalar_prefetch=0,
            grid=(grid_m, grid_k),
            in_specs=[
                pl.BlockSpec((tm, tk), lambda i, k: (i, k)),        # x tile (f32)
                pl.BlockSpec((tk, H1), lambda i, k: (k, 0)),        # w1 tile
                pl.BlockSpec((1, H1), lambda i, k: (0, 0)),         # b1 (resident)
                pl.BlockSpec((H1, H2), lambda i, k: (0, 0)),        # w2 (resident)
                pl.BlockSpec((1, H2), lambda i, k: (0, 0)),         # b2 (resident)
                pl.BlockSpec((1, H2), lambda i, k: (0, 0)),         # w3 row (resident)
                pl.BlockSpec(memory_space=pltpu.MemorySpace.SMEM),  # b3 scalar
            ],
            out_specs=pl.BlockSpec((1, tm), lambda i, k: (0, i)),   # lane-dense scores
            scratch_shapes=[pltpu.VMEM((tm, H1), jnp.float32)],     # layer-1 acc
        ),
        compiler_params=pltpu.CompilerParams(
            dimension_semantics=("parallel", "arbitrary"),
            vmem_limit_bytes=vmem_limit,
        ),
        cost_estimate=pl.CostEstimate(flops=flops, transcendentals=0,
                                      bytes_accessed=bytes_accessed),
    )(x, w1, b1, w2, b2, w3_row, b3)

    return out[0, :B].reshape(B, 1)


def init_params(key, in_features):
    """nn.Linear-style init. Weights stored (in, out) in bf16 for the kernel;
    the last layer's weight is stored as a (1, 256) row. Biases stay f32."""
    dims = [(in_features, 512), (512, 256), (256, 1)]
    params = []
    for li, (fan_in, fan_out) in enumerate(dims):
        key, kw, kb = jax.random.split(key, 3)
        bound = 1.0 / (fan_in ** 0.5)   # PyTorch default Linear init range
        w = jax.random.uniform(kw, (fan_in, fan_out), jnp.float32, -bound, bound)
        b = jax.random.uniform(kb, (1, fan_out), jnp.float32, -bound, bound)
        if li == 2:
            w = w.T                      # (1, 256) row
        params += [w.astype(jnp.bfloat16), b]
    return tuple(params)


def reference_forward(img, params):
    """Pure-JAX reference matching the kernel's bf16-matmul / f32-accumulate path."""
    w1, b1, w2, b2, w3_row, b3 = params
    x = img.reshape(img.shape[0], -1)
    h1 = _leaky_relu(jnp.dot(x.astype(jnp.bfloat16), w1,
                             preferred_element_type=jnp.float32) + b1)
    h2 = _leaky_relu(jnp.dot(h1.astype(jnp.bfloat16), w2,
                             preferred_element_type=jnp.float32) + b2)
    return jnp.dot(h2.astype(jnp.bfloat16), w3_row.T,
                   preferred_element_type=jnp.float32) + b3


if __name__ == "__main__":
    key = jax.random.PRNGKey(0)
    k_img, k_par = jax.random.split(key)

    # Small MNIST-like image: img_shape = (C, H, W) = (1, 28, 28) -> F = 784
    # (exercises the ragged-feature mask path, since 784 is not a multiple of 128).
    B, C, H, W = 2, 1, 28, 28
    img = jax.random.normal(k_img, (B, C, H, W), jnp.float32)

    params = init_params(k_par, C * H * W)

    score = jax.block_until_ready(discriminator_forward(img, params))
    ref = reference_forward(img, params)

    assert score.shape == (B, 1), score.shape
    assert jnp.allclose(score, ref, atol=2e-2, rtol=2e-2), (score, ref)

    print("KERNEL_OK")
</pallas_src>

<mosaic_0001>
module attributes {stable_mosaic.version = 11 : i64} {
  func.func @discriminator_kernel(%arg0: i32, %arg1: i32, %arg2: memref<16x896xf32, #tpu.memory_space<vmem>>, %arg3: memref<896x512xbf16, #tpu.memory_space<vmem>>, %arg4: memref<1x512xf32, #tpu.memory_space<vmem>>, %arg5: memref<512x256xbf16, #tpu.memory_space<vmem>>, %arg6: memref<1x256xf32, #tpu.memory_space<vmem>>, %arg7: memref<1x256xbf16, #tpu.memory_space<vmem>>, %arg8: memref<1x1xf32, #tpu.memory_space<smem>>, %arg9: memref<1x16xf32, #tpu.memory_space<vmem>>, %arg10: memref<16x512xf32, #tpu.memory_space<vmem>>) attributes {dimension_semantics = [#tpu.dimension_semantics<parallel>, #tpu.dimension_semantics<arbitrary>], iteration_bounds = array<i64: 1, 1>, scalar_prefetch = 0 : i64, scratch_operands = 1 : i64, tpu.core_type = #tpu.core_type<tc>, window_params = [{transform_indices = @transform_0, window_bounds = array<i64: 16, 896>}, {transform_indices = @transform_1, window_bounds = array<i64: 896, 512>}, {pipeline_mode = #tpu.pipeline_mode<synchronous>, transform_indices = @transform_2, window_bounds = array<i64: 1, 512>}, {pipeline_mode = #tpu.pipeline_mode<synchronous>, transform_indices = @transform_3, window_bounds = array<i64: 512, 256>}, {pipeline_mode = #tpu.pipeline_mode<synchronous>, transform_indices = @transform_4, window_bounds = array<i64: 1, 256>}, {pipeline_mode = #tpu.pipeline_mode<synchronous>, transform_indices = @transform_5, window_bounds = array<i64: 1, 256>}, {transform_indices = @transform_6, window_bounds = array<i64: 1, 1>}, {transform_indices = @transform_7, window_bounds = array<i64: 1, 16>}]} {
    %c0_i32 = arith.constant 0 : i32
    %0 = arith.cmpi eq, %arg1, %c0_i32 : i32
    %1 = arith.extui %0 : i1 to i32
    %c0_i32_0 = arith.constant 0 : i32
    %2 = arith.cmpi ne, %1, %c0_i32_0 : i32
    scf.if %2 {
      %c0_11 = arith.constant 0 : index
      %c0_12 = arith.constant 0 : index
      %21 = vector.load %arg4[%c0_11, %c0_12] : memref<1x512xf32, #tpu.memory_space<vmem>>, vector<1x512xf32>
      %22 = vector.shape_cast %21 : vector<1x512xf32> to vector<1x512xf32>
      %23 = vector.broadcast %22 : vector<1x512xf32> to vector<16x512xf32>
      %c0_13 = arith.constant 0 : index
      %c0_14 = arith.constant 0 : index
      %24 = vector.load %arg10[%c0_13, %c0_14] : memref<16x512xf32, #tpu.memory_space<vmem>>, vector<16x512xf32>
      tpu.vector_store %arg10[%c0_13, %c0_14], %23 {strides = array<i32>} : memref<16x512xf32, #tpu.memory_space<vmem>>, vector<16x512xf32>,
    } else {
    }
    %c0 = arith.constant 0 : index
    %c0_1 = arith.constant 0 : index
    %3 = vector.load %arg2[%c0, %c0_1] : memref<16x896xf32, #tpu.memory_space<vmem>>, vector<16x896xf32>
    %c896_i32 = arith.constant 896 : i32
    %4 = arith.muli %arg1, %c896_i32 : i32
    %5 = tpu.iota {dimensions = array<i32: 1>} : vector<16x896xi32>
    %6 = vector.broadcast %4 : i32 to vector<16x896xi32>
    %7 = arith.addi %6, %5 : vector<16x896xi32>
    %c784_i32 = arith.constant 784 : i32
    %8 = vector.broadcast %c784_i32 : i32 to vector<16x896xi32>
    %9 = arith.cmpi slt, %7, %8 : vector<16x896xi32>
    %cst = arith.constant 0.000000e+00 : f32
    %10 = vector.broadcast %cst : f32 to vector<16x896xf32>
    %11 = arith.select %9, %3, %10 : vector<16x896xi1>, vector<16x896xf32>
    %c0_2 = arith.constant 0 : index
    %c0_3 = arith.constant 0 : index
    %12 = vector.load %arg10[%c0_2, %c0_3] : memref<16x512xf32, #tpu.memory_space<vmem>>, vector<16x512xf32>
    %13 = arith.truncf %11 : vector<16x896xf32> to vector<16x896xbf16>
    %c0_4 = arith.constant 0 : index
    %c0_5 = arith.constant 0 : index
    %14 = vector.load %arg3[%c0_4, %c0_5] : memref<896x512xbf16, #tpu.memory_space<vmem>>, vector<896x512xbf16>
    %cst_6 = arith.constant dense<0.000000e+00> : vector<16x512xf32>
    %15 = tpu.matmul %13, %14, %cst_6 {dimension_numbers = #tpu.dot_dimension_numbers<[1], [0], [0], [1], [0, 0, 1, 1], [], []>} : vector<16x896xbf16>, vector<896x512xbf16>, vector<16x512xf32> -> vector<16x512xf32>
    %16 = arith.addf %12, %15 : vector<16x512xf32>
    %c0_7 = arith.constant 0 : index
    %c0_8 = arith.constant 0 : index
    %17 = vector.load %arg10[%c0_7, %c0_8] : memref<16x512xf32, #tpu.memory_space<vmem>>, vector<16x512xf32>
    tpu.vector_store %arg10[%c0_7, %c0_8], %16 {strides = array<i32>} : memref<16x512xf32, #tpu.memory_space<vmem>>, vector<16x512xf32>,
    %c0_i32_9 = arith.constant 0 : i32
    %18 = arith.cmpi eq, %arg1, %c0_i32_9 : i32
    %19 = arith.extui %18 : i1 to i32
    %c0_i32_10 = arith.constant 0 : i32
    %20 = arith.cmpi ne, %19, %c0_i32_10 : i32
    scf.if %20 {
      %c0_11 = arith.constant 0 : index
      %c0_12 = arith.constant 0 : index
      %21 = vector.load %arg10[%c0_11, %c0_12] : memref<16x512xf32, #tpu.memory_space<vmem>>, vector<16x512xf32>
      %cst_13 = arith.constant 0.000000e+00 : f32
      %22 = vector.broadcast %cst_13 : f32 to vector<16x512xf32>
      %23 = arith.cmpf ogt, %21, %22 : vector<16x512xf32>
      %cst_14 = arith.constant 2.000000e-01 : f32
      %24 = vector.broadcast %cst_14 : f32 to vector<16x512xf32>
      %25 = arith.mulf %24, %21 : vector<16x512xf32>
      %26 = arith.select %23, %21, %25 : vector<16x512xi1>, vector<16x512xf32>
      %27 = arith.truncf %26 : vector<16x512xf32> to vector<16x512xbf16>
      %c0_15 = arith.constant 0 : index
      %c0_16 = arith.constant 0 : index
      %28 = vector.load %arg5[%c0_15, %c0_16] : memref<512x256xbf16, #tpu.memory_space<vmem>>, vector<512x256xbf16>
      %cst_17 = arith.constant dense<0.000000e+00> : vector<16x256xf32>
      %29 = tpu.matmul %27, %28, %cst_17 {dimension_numbers = #tpu.dot_dimension_numbers<[1], [0], [0], [1], [0, 0, 1, 1], [], []>} : vector<16x512xbf16>, vector<512x256xbf16>, vector<16x256xf32> -> vector<16x256xf32>
      %c0_18 = arith.constant 0 : index
      %c0_19 = arith.constant 0 : index
      %30 = vector.load %arg6[%c0_18, %c0_19] : memref<1x256xf32, #tpu.memory_space<vmem>>, vector<1x256xf32>
      %31 = vector.broadcast %30 : vector<1x256xf32> to vector<16x256xf32>
      %32 = arith.addf %29, %31 : vector<16x256xf32>
      %cst_20 = arith.constant 0.000000e+00 : f32
      %33 = vector.broadcast %cst_20 : f32 to vector<16x256xf32>
      %34 = arith.cmpf ogt, %32, %33 : vector<16x256xf32>
      %cst_21 = arith.constant 2.000000e-01 : f32
      %35 = vector.broadcast %cst_21 : f32 to vector<16x256xf32>
      %36 = arith.mulf %35, %32 : vector<16x256xf32>
      %37 = arith.select %34, %32, %36 : vector<16x256xi1>, vector<16x256xf32>
      %c0_22 = arith.constant 0 : index
      %c0_23 = arith.constant 0 : index
      %38 = vector.load %arg7[%c0_22, %c0_23] : memref<1x256xbf16, #tpu.memory_space<vmem>>, vector<1x256xbf16>
      %39 = arith.truncf %37 : vector<16x256xf32> to vector<16x256xbf16>
      %40 = tpu.transpose %39, [1, 0] : vector<16x256xbf16> -> vector<256x16xbf16>
      %cst_24 = arith.constant dense<0.000000e+00> : vector<1x16xf32>
      %41 = tpu.matmul %38, %40, %cst_24 {dimension_numbers = #tpu.dot_dimension_numbers<[1], [0], [0], [1], [0, 0, 1, 1], [], []>} : vector<1x256xbf16>, vector<256x16xbf16>, vector<1x16xf32> -> vector<1x16xf32>
      %c0_25 = arith.constant 0 : index
      %c0_26 = arith.constant 0 : index
      %42 = memref.load %arg8[%c0_25, %c0_26] : memref<1x1xf32, #tpu.memory_space<smem>>
      %43 = vector.broadcast %42 : f32 to vector<1x16xf32>
      %44 = arith.addf %41, %43 : vector<1x16xf32>
      %c0_27 = arith.constant 0 : index
      %c0_28 = arith.constant 0 : index
      %45 = vector.load %arg9[%c0_27, %c0_28] : memref<1x16xf32, #tpu.memory_space<vmem>>, vector<1x16xf32>
      tpu.vector_store %arg9[%c0_27, %c0_28], %44 {strides = array<i32>} : memref<1x16xf32, #tpu.memory_space<vmem>>, vector<1x16xf32>,
    } else {
    }
    return
  }
  func.func @transform_0(%arg0: i32, %arg1: i32) -> (i32, i32) {
    %c0_i32 = arith.constant 0 : i32
    return %arg0, %arg1 : i32, i32
  }
  func.func @transform_1(%arg0: i32, %arg1: i32) -> (i32, i32) {
    %c0_i32 = arith.constant 0 : i32
    %c0_i32_0 = arith.constant 0 : i32
    return %arg1, %c0_i32 : i32, i32
  }
  func.func @transform_2(%arg0: i32, %arg1: i32) -> (i32, i32) {
    %c0_i32 = arith.constant 0 : i32
    %c0_i32_0 = arith.constant 0 : i32
    %c0_i32_1 = arith.constant 0 : i32
    return %c0_i32, %c0_i32_0 : i32, i32
  }
  func.func @transform_3(%arg0: i32, %arg1: i32) -> (i32, i32) {
    %c0_i32 = arith.constant 0 : i32
    %c0_i32_0 = arith.constant 0 : i32
    %c0_i32_1 = arith.constant 0 : i32
    return %c0_i32, %c0_i32_0 : i32, i32
  }
  func.func @transform_4(%arg0: i32, %arg1: i32) -> (i32, i32) {
    %c0_i32 = arith.constant 0 : i32
    %c0_i32_0 = arith.constant 0 : i32
    %c0_i32_1 = arith.constant 0 : i32
    return %c0_i32, %c0_i32_0 : i32, i32
  }
  func.func @transform_5(%arg0: i32, %arg1: i32) -> (i32, i32) {
    %c0_i32 = arith.constant 0 : i32
    %c0_i32_0 = arith.constant 0 : i32
    %c0_i32_1 = arith.constant 0 : i32
    return %c0_i32, %c0_i32_0 : i32, i32
  }
  func.func @transform_6(%arg0: i32, %arg1: i32) -> (i32, i32) {
    %c0_i32 = arith.constant 0 : i32
    %c0_i32_0 = arith.constant 0 : i32
    %c0_i32_1 = arith.constant 0 : i32
    return %c0_i32, %c0_i32_0 : i32, i32
  }
  func.func @transform_7(%arg0: i32, %arg1: i32) -> (i32, i32) {
    %c0_i32 = arith.constant 0 : i32
    %c0_i32_0 = arith.constant 0 : i32
    return %c0_i32, %arg0 : i32, i32
  }
}

</mosaic_0001>

<bundles_post_ra>
// kernel: tpu_custom_call.1
= control target key start
LH: loop header
LB: loop body
LE: loop exit
PB: predicated region body
PF: predicated region fallthrough
CT: control target
= control target key end

     0   :  { %13 = vsyncpa [#allocation5], 0  ;;  %s3765_s0 = inlined_call_operand.hbm [shape: f32[2,784], index: 0, kind: input, shape index: {}]   ;;  %s3766_s1 = inlined_call_operand.hbm [shape: bf16[896,512], index: 1, kind: input, shape index: {}]   ;;  %s3767_s2 = inlined_call_operand.vmem [shape: f32[1,512], index: 2, kind: input, shape index: {}]   ;;  %s3768_s3 = inlined_call_operand.hbm [shape: bf16[512,256], index: 3, kind: input, shape index: {}]   ;;  %s3769_s4 = inlined_call_operand.vmem [shape: f32[1,256], index: 4, kind: input, shape index: {}]   ;;  %s3770_s5 = inlined_call_operand.vmem [shape: bf16[1,256], index: 5, kind: input, shape index: {}]   ;;  %s3771_s6 = inlined_call_operand.<no memory space> [shape: f32[1,1], index: 6, kind: input, shape index: {}]   ;;  %s3772_s7 = inlined_call_operand.hbm [shape: f32[1,16], index: 7, kind: output, shape index: {}]  }
   0x1   :  { %14 = vsyncpa [#allocation8], 0 }
   0x2   :  { %15 = vsyncpa [#allocation6], 0 }
   0x3   :  { %20 = vsyncadd [#allocation5], 1568  ;;  %s3560_s24 = smov [#allocation7]   ;;  %s3466_s28 = scalar_lea.hbm %s3766_s1, 28672 }
   0x4   :  { %s33_s25 = sshll.u32 %s3560_s24, 4  ;;  %p3467_p0 = scmp.ne.s32.totalorder %s3766_s1, %s3466_s28  ;;  %s34_s25 = int_to_ptr.vmem [resolvable:$true] %s33_s25 }
   0x5   :  { %p3470_p1 = scmp.lt.u32.totalorder %s3466_s28, %s3766_s1 }
   0x7   :  { %p3472_p2 = pnand %p3470_p1, %p3467_p0 }
   0x9   :  { %3475 = shalt.err (!%p3472_p2)
}
   0xa   :  { %s3476_s10 = scalar_lea.vmem %s34_s25, 28672  ;;  %p3481_p4 = scmp.lt.s32.totalorder %s34_s25, %s34_s25 }
   0xb   :  { %p3477_p3 = scmp.ne.s32.totalorder %s34_s25, %s3476_s10  ;;  %p3482_p5 = scmp.lt.s32.totalorder %s3476_s10, %s3476_s10 }
   0xd   :  { %p3483_p6 = por %p3482_p5, %p3481_p4 }
   0xf   :  { %p3484_p7 = pnand %p3483_p6, %p3477_p3 }
  0x11   :  { %3487 = shalt.err (!%p3484_p7)
}
  0x12   :  { %s3561_s11 = smov 256   ;;  %s3562_s12 = smov 16  }
  0x13   :  { %39 = dma.hbm_to_vmem [thread:$0]  %s3766_s1, 28672, %s34_s25, [#allocation8], %s3561_s11, %s3561_s11, %s3562_s12  }
  0x14   :  { %s3563_s15 = smov [#allocation4]   ;;  %s3488_s19 = scalar_lea.hbm %s3765_s0, 224 }
  0x15   :  { %s21_s16 = sshll.u32 %s3563_s15, 4  ;;  %p3489_p8 = scmp.ne.s32.totalorder %s3765_s0, %s3488_s19  ;;  %s22_s16 = int_to_ptr.vmem [resolvable:$true] %s21_s16 }
  0x16   :  { %p3492_p9 = scmp.lt.u32.totalorder %s3488_s19, %s3765_s0 }
  0x18   :  { %p3494_p10 = pnand %p3492_p9, %p3489_p8 }
  0x1a   :  { %3497 = shalt.err (!%p3494_p10)
}
  0x1b   :  { %s3498_s24 = scalar_lea.vmem %s22_s16, 224  ;;  %s3502_s1 = scalar_lea.vmem %s22_s16, 1792 }
  0x1c   :  { %p3499_p11 = scmp.ne.s32.totalorder %s22_s16, %s3498_s24  ;;  %p3503_p12 = scmp.lt.s32.totalorder %s22_s16, %s22_s16 }
  0x1d   :  { %p3504_p13 = scmp.lt.s32.totalorder %s3502_s1, %s3498_s24 }
  0x1f   :  { %p3505_p0 = por %p3504_p13, %p3503_p12 }
  0x21   :  { %p3506_p1 = pnand %p3505_p0, %p3499_p11 }
  0x23   :  { %3509 = shalt.err (!%p3506_p1)
}
  0x24   :  { %s3564_s25 = smov 224   ;;  %s3565_s26 = smov 14  }
  0x25   :  { %27 = dma.hbm_to_vmem [thread:$0]  %s3765_s0, 224, %s22_s16, [#allocation5], %s3564_s25, %s3564_s25, %s3565_s26  }
  0x26   :  { %s3566_s29 = smov [#allocation9]   ;;  %s3510_s10 = scalar_lea.hbm %s3768_s3, 8192 }
  0x27   :  { %s47_s30 = sshll.u32 %s3566_s29, 4  ;;  %p3511_p2 = scmp.ne.s32.totalorder %s3768_s3, %s3510_s10  ;;  %s48_s30 = int_to_ptr.vmem [resolvable:$true] %s47_s30 }
  0x28   :  { %p3514_p3 = scmp.lt.u32.totalorder %s3510_s10, %s3768_s3 }
  0x2a   :  { %p3516_p4 = pnand %p3514_p3, %p3511_p2 }
  0x2c   :  { %3519 = shalt.err (!%p3516_p4)
}
  0x2d   :  { %s3520_s15 = scalar_lea.vmem %s48_s30, 8192  ;;  %p3525_p6 = scmp.lt.s32.totalorder %s48_s30, %s48_s30 }
  0x2e   :  { %p3521_p5 = scmp.ne.s32.totalorder %s48_s30, %s3520_s15  ;;  %p3526_p7 = scmp.lt.s32.totalorder %s3520_s15, %s3520_s15 }
  0x30   :  { %p3527_p8 = por %p3526_p7, %p3525_p6 }
  0x32   :  { %p3528_p9 = pnand %p3527_p8, %p3521_p5 }
  0x34   :  { %3531 = shalt.err (!%p3528_p9)
}
  0x35   :  { %s3567_s0 = smov 128   ;;  %s3568_s16 = smov 8  }
  0x36   :  { %53 = dma.hbm_to_vmem [thread:$0]  %s3768_s3, 8192, %s48_s30, [#allocation8], %s3567_s0, %s3567_s0, %s3568_s16  }
  0x37   :  { %3554 = dma.done.wait [#allocation5], 1792  }
  0x38   :  { %3555 = vsyncadd [#allocation5], 4294965504 }
  0x39   :  { %3556 = dma.done.wait [#allocation8], 36864  }
  0x3a   :  { %3557 = vsyncadd [#allocation8], 4294930432  ;;  %v3010_v0 = vld [vmem:[#allocation7 + $0x4] ss:$16 sps:$4 sm:$0xff]   ;;  %v3014_v2 = vld [vmem:[#allocation7] ss:$16 sps:$4 sm:$0xff]   ;;  %v76_v39 = vlaneseq }
  0x3b   :  { %v3012_v1 = vld [vmem:[#allocation7 + $0x204] ss:$16 sps:$4 sm:$0xff]   ;;  %1689 = vmatprep.subr.bf16.mxu1 %v3010_v0  ;;  %v3015_v3 = vld [vmem:[#allocation7 + $0x200] ss:$16 sps:$4 sm:$0xff]   ;;  %v3569_v40 = vmov 1983009808  }
  0x3c   :  { %1732 = vmatprep.subr.bf16.mxu0 %v3012_v1  ;;  %v3016_v4 = vld [vmem:[#allocation7 + $0x24] ss:$16 sps:$4 sm:$0xff]   ;;  %1690 = vmatpush1.bf16.msra.mxu1 %v3014_v2  ;;  %v3020_v6 = vld [vmem:[#allocation7 + $0x20] ss:$16 sps:$4 sm:$0xff]   ;;  %v165_v41 = vunpack.c.l.s4 %v3569_v40  ;;  %v3650_v47 = vshrl.u32 %v76_v39, 7  ;;  %s3572_s23 = smov [#allocation10]  }
  0x3d   :  { %1733 = vmatpush1.bf16.msra.mxu0 %v3015_v3  ;;  %v3018_v5 = vld [vmem:[#allocation7 + $0x224] ss:$16 sps:$4 sm:$0xff]   ;;  %1691 = vmatprep.subr.bf16.mxu1 %v3016_v4  ;;  %v3021_v7 = vld [vmem:[#allocation7 + $0x220] ss:$16 sps:$4 sm:$0xff]   ;;  %v3108_v57 = vld [vmem:[#allocation4 + $0x1c] ss:$14 sps:$4 sm:$0xff]  }
  0x3e   :  { %1734 = vmatprep.subr.bf16.mxu0 %v3018_v5  ;;  %v3022_v8 = vld [vmem:[#allocation7 + $0x44] ss:$16 sps:$4 sm:$0xff]   ;;  %v3026_v10 = vld [vmem:[#allocation7 + $0x40] ss:$16 sps:$4 sm:$0xff]   ;;  %v166_v48 = vunpack.c.0.s8 %v165_v41  ;;  %v3116_v2 = vld [vmem:[#allocation4 + $0x3c] ss:$14 sps:$4 sm:$0xff]  }
  0x3f   :  { %v3024_v9 = vld [vmem:[#allocation7 + $0x244] ss:$16 sps:$4 sm:$0xff]   ;;  %v3027_v11 = vld [vmem:[#allocation7 + $0x240] ss:$16 sps:$4 sm:$0xff]   ;;  %v3129_v40 = vld [vmem:[#allocation7 + $0x2c] ss:$16 sps:$4 sm:$0xff]  }
  0x40   :  { %1692 = vmatpush1.bf16.msra.mxu1 %v3020_v6  ;;  %v3028_v12 = vld [vmem:[#allocation7 + $0x64] ss:$16 sps:$4 sm:$0xff]   ;;  %v3032_v14 = vld [vmem:[#allocation7 + $0x60] ss:$16 sps:$4 sm:$0xff]   ;;  %v3653_v55 = vsub.s32 %v166_v48, %v3650_v47  ;;  %s2660_s24 = sshll.u32 %s3572_s23, 4  ;;  %vm2652_vm14 = vcmask 122880   ;;  %s2661_s24 = int_to_ptr.vmem [resolvable:$true] %s2660_s24 }
  0x41   :  { %1735 = vmatpush1.bf16.msra.mxu0 %v3021_v7  ;;  %1693 = vmatprep.subr.bf16.mxu1 %v3022_v8  ;;  %v3030_v13 = vld [vmem:[#allocation7 + $0x264] ss:$16 sps:$4 sm:$0xff]   ;;  %v3033_v15 = vld [vmem:[#allocation7 + $0x260] ss:$16 sps:$4 sm:$0xff]   ;;  %s3532_s1 = scalar_lea.vmem %s2661_s24, 16  ;;  %s3536_s25 = scalar_lea.vmem %s2661_s24, 32 }
  0x42   :  { %1736 = vmatprep.subr.bf16.mxu0 %v3024_v9  ;;  %v3034_v16 = vld [vmem:[#allocation7 + $0x84] ss:$16 sps:$4 sm:$0xff]   ;;  %v3038_v18 = vld [vmem:[#allocation7 + $0x80] ss:$16 sps:$4 sm:$0xff]   ;;  %v184_v0 = vrot.slane %v3108_v57, %v3653_v55  ;;  %p3533_p10 = scmp.ne.s32.totalorder %s2661_s24, %s3532_s1  ;;  %p3537_p11 = scmp.lt.s32.totalorder %s2661_s24, %s2661_s24 }
  0x43   :  { %v3036_v17 = vld [vmem:[#allocation7 + $0x284] ss:$16 sps:$4 sm:$0xff]   ;;  %v3039_v19 = vld [vmem:[#allocation7 + $0x280] ss:$16 sps:$4 sm:$0xff]   ;;  %p3538_p12 = scmp.lt.s32.totalorder %s3536_s25, %s3532_s1 }
  0x44   :  { %1694 = vmatpush1.bf16.msra.mxu1 %v3026_v10  ;;  %v3040_v20 = vld [vmem:[#allocation7 + $0xa4] ss:$16 sps:$4 sm:$0xff]   ;;  %v3044_v22 = vld [vmem:[#allocation7 + $0xa0] ss:$16 sps:$4 sm:$0xff]  }
  0x45   :  { %1737 = vmatpush1.bf16.msra.mxu0 %v3027_v11  ;;  %1695 = vmatprep.subr.bf16.mxu1 %v3028_v12  ;;  %v3042_v21 = vld [vmem:[#allocation7 + $0x2a4] ss:$16 sps:$4 sm:$0xff]   ;;  %v3045_v23 = vld [vmem:[#allocation7 + $0x2a0] ss:$16 sps:$4 sm:$0xff]   ;;  %v248_v12 = vrot.slane %v3116_v2, %v3653_v55  ;;  %v3165_v2 = vld [vmem:[#allocation7 + $0xec] ss:$16 sps:$4 sm:$0xff]   ;;  %p3539_p13 = por %p3538_p12, %p3537_p11 }
  0x46   :  { %1738 = vmatprep.subr.bf16.mxu0 %v3030_v13  ;;  %v3046_v24 = vld [vmem:[#allocation7 + $0xc4] ss:$16 sps:$4 sm:$0xff]   ;;  %v3050_v26 = vld [vmem:[#allocation7 + $0xc0] ss:$16 sps:$4 sm:$0xff]  }
  0x47   :  { %v3048_v25 = vld [vmem:[#allocation7 + $0x2c4] ss:$16 sps:$4 sm:$0xff]   ;;  %v3051_v27 = vld [vmem:[#allocation7 + $0x2c0] ss:$16 sps:$4 sm:$0xff]   ;;  %p3540_p0 = pnand %p3539_p13, %p3533_p10 }
  0x48   :  { %1696 = vmatpush1.bf16.msra.mxu1 %v3032_v14  ;;  %v3052_v28 = vld [vmem:[#allocation7 + $0xe4] ss:$16 sps:$4 sm:$0xff]   ;;  %v3056_v30 = vld [vmem:[#allocation7 + $0xe0] ss:$16 sps:$4 sm:$0xff]  }
  0x49   :  { %1739 = vmatpush1.bf16.msra.mxu0 %v3033_v15  ;;  %1697 = vmatprep.subr.bf16.mxu1 %v3034_v16  ;;  %v3054_v29 = vld [vmem:[#allocation7 + $0x2e4] ss:$16 sps:$4 sm:$0xff]   ;;  %v3057_v31 = vld [vmem:[#allocation7 + $0x2e0] ss:$16 sps:$4 sm:$0xff]  }
  0x4a   :  { %1740 = vmatprep.subr.bf16.mxu0 %v3036_v17  ;;  %v3058_v32 = vld [vmem:[#allocation7 + $0x104] ss:$16 sps:$4 sm:$0xff]   ;;  %v3062_v34 = vld [vmem:[#allocation7 + $0x100] ss:$16 sps:$4 sm:$0xff]  }
  0x4b   :  { %v3060_v33 = vld [vmem:[#allocation7 + $0x304] ss:$16 sps:$4 sm:$0xff]   ;;  %v3063_v35 = vld [vmem:[#allocation7 + $0x300] ss:$16 sps:$4 sm:$0xff]  }
  0x4c   :  { %1698 = vmatpush1.bf16.msra.mxu1 %v3038_v18  ;;  %v3064_v36 = vld [vmem:[#allocation7 + $0x124] ss:$16 sps:$4 sm:$0xff]   ;;  %v3068_v38 = vld [vmem:[#allocation7 + $0x120] ss:$16 sps:$4 sm:$0xff]  }
  0x4d   :  { %1741 = vmatpush1.bf16.msra.mxu0 %v3039_v19  ;;  %1699 = vmatprep.subr.bf16.mxu1 %v3040_v20  ;;  %v3066_v37 = vld [vmem:[#allocation7 + $0x324] ss:$16 sps:$4 sm:$0xff]   ;;  %v3069_v42 = vld [vmem:[#allocation7 + $0x320] ss:$16 sps:$4 sm:$0xff]  }
  0x4e   :  { %1742 = vmatprep.subr.bf16.mxu0 %v3042_v21  ;;  %v3070_v43 = vld [vmem:[#allocation7 + $0x144] ss:$16 sps:$4 sm:$0xff]   ;;  %v3074_v45 = vld [vmem:[#allocation7 + $0x140] ss:$16 sps:$4 sm:$0xff]  }
  0x4f   :  { %v3072_v44 = vld [vmem:[#allocation7 + $0x344] ss:$16 sps:$4 sm:$0xff]   ;;  %v3075_v46 = vld [vmem:[#allocation7 + $0x340] ss:$16 sps:$4 sm:$0xff]  }
  0x50   :  { %1700 = vmatpush1.bf16.msra.mxu1 %v3044_v22  ;;  %v3076_v49 = vld [vmem:[#allocation7 + $0x164] ss:$16 sps:$4 sm:$0xff]   ;;  %v3080_v51 = vld [vmem:[#allocation7 + $0x160] ss:$16 sps:$4 sm:$0xff]  }
  0x51   :  { %1743 = vmatpush1.bf16.msra.mxu0 %v3045_v23  ;;  %1701 = vmatprep.subr.bf16.mxu1 %v3046_v24  ;;  %v3078_v50 = vld [vmem:[#allocation7 + $0x364] ss:$16 sps:$4 sm:$0xff]   ;;  %v3081_v52 = vld [vmem:[#allocation7 + $0x360] ss:$16 sps:$4 sm:$0xff]  }
  0x52   :  { %1744 = vmatprep.subr.bf16.mxu0 %v3048_v25  ;;  %v3082_v53 = vld [vmem:[#allocation7 + $0x184] ss:$16 sps:$4 sm:$0xff]   ;;  %v3106_v56 = vld [vmem:[#allocation4] ss:$14 sps:$4 sm:$0xff]  }
  0x53   :  { %v3084_v54 = vld [vmem:[#allocation7 + $0x384] ss:$16 sps:$4 sm:$0xff]   ;;  %v3086_v58 = vld [vmem:[#allocation7 + $0x180] ss:$16 sps:$4 sm:$0xff]   ;;  %v170_v63 = vrot.slane %v3106_v56, %v3653_v55  ;;  %v3145_v56 = vld [vmem:[#allocation7 + $0x88] ss:$16 sps:$4 sm:$0xff]  }
  0x54   :  { %1702 = vmatpush1.bf16.msra.mxu1 %v3050_v26  ;;  %v3087_v59 = vld [vmem:[#allocation7 + $0x380] ss:$16 sps:$4 sm:$0xff]   ;;  %v3110_v60 = vld [vmem:[#allocation4 + $0x38] ss:$14 sps:$4 sm:$0xff]  }
  0x55   :  { %1745 = vmatpush1.bf16.msra.mxu0 %v3051_v27  ;;  %1703 = vmatprep.subr.bf16.mxu1 %v3052_v28  ;;  %v3112_v61 = vld [vmem:[#allocation4 + $0x54] ss:$14 sps:$4 sm:$0xff]   ;;  %v3117_v3 = vld [vmem:[#allocation4 + $0x58] ss:$14 sps:$4 sm:$0xff]   ;;  %v241_v5 = vrot.slane %v3110_v60, %v3653_v55  ;;  %v193_v9 = vcombine.high %v170_v63, %v184_v0  ;;  %v192_v28 = vcombine.low %v170_v63, %v184_v0 }
  0x56   :  { %1746 = vmatprep.subr.bf16.mxu0 %v3054_v29  ;;  %v3114_v62 = vld [vmem:[#allocation4 + $0x4] ss:$14 sps:$4 sm:$0xff]   ;;  %v3115_v1 = vld [vmem:[#allocation4 + $0x20] ss:$14 sps:$4 sm:$0xff]   ;;  %v255_v6 = vrot.slane %v3112_v61, %v3653_v55  ;;  %v262_v13 = vrot.slane %v3117_v3, %v3653_v55  ;;  %v3151_v60 = vld [vmem:[#allocation7 + $0xa8] ss:$16 sps:$4 sm:$0xff]  }
  0x57   :  { %v3088_v4 = vld [vmem:[#allocation7 + $0x1a4] ss:$16 sps:$4 sm:$0xff]   ;;  %v177_v7 = vrot.slane %v3114_v62, %v3653_v55  ;;  %v191_v10 = vrot.slane %v3115_v1, %v3653_v55  ;;  %v3092_v14 = vld [vmem:[#allocation7 + $0x1a0] ss:$16 sps:$4 sm:$0xff]   ;;  %v3159_v62 = vld [vmem:[#allocation7 + $0xcc] ss:$16 sps:$4 sm:$0xff]  }
  0x58   :  { %1704 = vmatpush1.bf16.msra.mxu1 %v3056_v30  ;;  %v3090_v8 = vld [vmem:[#allocation7 + $0x3a4] ss:$16 sps:$4 sm:$0xff]   ;;  %v264_v11 = vcombine.high %v241_v5, %v255_v6  ;;  %v3093_v15 = vld [vmem:[#allocation7 + $0x3a0] ss:$16 sps:$4 sm:$0xff]   ;;  %v266_v19 = vcombine.high %v248_v12, %v262_v13  ;;  %v263_v29 = vcombine.low %v241_v5, %v255_v6  ;;  %v3157_v0 = vld [vmem:[#allocation7 + $0xc8] ss:$16 sps:$4 sm:$0xff]  }
  0x59   :  { %1747 = vmatpush1.bf16.msra.mxu0 %v3057_v31  ;;  %1705 = vmatprep.subr.bf16.mxu1 %v3058_v32  ;;  %v195_v16 = vcombine.high %v177_v7, %v191_v10  ;;  %v3094_v17 = vld [vmem:[#allocation7 + $0x1c4] ss:$16 sps:$4 sm:$0xff]   ;;  %v3098_v22 = vld [vmem:[#allocation7 + $0x1c0] ss:$16 sps:$4 sm:$0xff]   ;;  %v194_v30 = vcombine.low %v177_v7, %v191_v10  ;;  %v265_v31 = vcombine.low %v248_v12, %v262_v13  ;;  %v3171_v6 = vld [vmem:[#allocation7 + $0x10c] ss:$16 sps:$4 sm:$0xff]  }
  0x5a   :  { %1748 = vmatprep.subr.bf16.mxu0 %v3060_v33  ;;  %v339_v18 = vpack.c.bf16 %v264_v11, %v193_v9  ;;  %v3096_v20 = vld [vmem:[#allocation7 + $0x3c4] ss:$16 sps:$4 sm:$0xff]   ;;  %v3099_v23 = vld [vmem:[#allocation7 + $0x3c0] ss:$16 sps:$4 sm:$0xff]   ;;  %v3123_v33 = vld [vmem:[#allocation7 + $0xc] ss:$16 sps:$4 sm:$0xff]  }
  0x5b   :  { %v3663_v21 = vpack.c.bf16 %v266_v19, %v195_v16  ;;  %v3100_v24 = vld [vmem:[#allocation7 + $0x1e4] ss:$16 sps:$4 sm:$0xff]   ;;  %v3104_v26 = vld [vmem:[#allocation7 + $0x1e0] ss:$16 sps:$4 sm:$0xff]   ;;  %v3169_v13 = vld [vmem:[#allocation7 + $0x108] ss:$16 sps:$4 sm:$0xff]  }
  0x5c   :  { %1706 = vmatpush1.bf16.msra.mxu1 %v3062_v34  ;;  %1721 = vmatprep.mubr.bf16.mxu1 %v339_v18  ;;  %v3102_v25 = vld [vmem:[#allocation7 + $0x3e4] ss:$16 sps:$4 sm:$0xff]   ;;  %v3105_v27 = vld [vmem:[#allocation7 + $0x3e0] ss:$16 sps:$4 sm:$0xff]   ;;  %v3666_v34 = vpack.c.bf16 %v263_v29, %v192_v28  ;;  %v3177_v16 = vld [vmem:[#allocation7 + $0x12c] ss:$16 sps:$4 sm:$0xff]  }
  0x5d   :  { %1749 = vmatpush1.bf16.msra.mxu0 %v3063_v35  ;;  %1707 = vmatprep.subr.bf16.mxu1 %v3064_v36  ;;  %v3120_v32 = vld [vmem:[#allocation7 + $0x404] ss:$16 sps:$4 sm:$0xff]   ;;  %v3118_v35 = vld [vmem:[#allocation7 + $0x400] ss:$16 sps:$4 sm:$0xff]   ;;  %v3121_v36 = vld [vmem:[#allocation7 + $0x8] ss:$16 sps:$4 sm:$0xff]  }
  0x5e   :  { %1750 = vmatprep.subr.bf16.mxu0 %v3066_v37  ;;  %1764 = vmatprep.mubr.bf16.mxu0 %v3663_v21  ;;  %v3668_v37 = vpack.c.bf16 %v265_v31, %v194_v30  ;;  %v3124_v41 = vld [vmem:[#allocation7 + $0x420] ss:$16 sps:$4 sm:$0xff]   ;;  %v3138_v48 = vld [vmem:[#allocation7 + $0x464] ss:$16 sps:$4 sm:$0xff]   ;;  %v3181_v28 = vld [vmem:[#allocation7 + $0x148] ss:$16 sps:$4 sm:$0xff]  }
  0x5f   :  { %v3150_v57 = vld [vmem:[#allocation7 + $0x4a4] ss:$16 sps:$4 sm:$0xff]   ;;  %v3154_v63 = vld [vmem:[#allocation7 + $0x4c0] ss:$16 sps:$4 sm:$0xff]   ;;  %v3189_v30 = vld [vmem:[#allocation7 + $0x16c] ss:$16 sps:$4 sm:$0xff]  }
  0x60   :  { %1708 = vmatpush1.bf16.msra.mxu1 %v3068_v38  ;;  %v3126_v38 = vld [vmem:[#allocation7 + $0x424] ss:$16 sps:$4 sm:$0xff]   ;;  %v3160_v3 = vld [vmem:[#allocation7 + $0x4e0] ss:$16 sps:$4 sm:$0xff]  }
  0x61   :  { %1751 = vmatpush1.bf16.msra.mxu0 %v3069_v42  ;;  %1709 = vmatprep.subr.bf16.mxu1 %v3070_v43  ;;  %v3127_v42 = vld [vmem:[#allocation7 + $0x28] ss:$16 sps:$4 sm:$0xff]   ;;  %v3132_v43 = vld [vmem:[#allocation7 + $0x444] ss:$16 sps:$4 sm:$0xff]   ;;  %v3166_v9 = vld [vmem:[#allocation7 + $0x500] ss:$16 sps:$4 sm:$0xff]  }
  0x62   :  { %1752 = vmatprep.subr.bf16.mxu0 %v3072_v44  ;;  %v3135_v44 = vld [vmem:[#allocation7 + $0x4c] ss:$16 sps:$4 sm:$0xff]   ;;  %v3156_v61 = vld [vmem:[#allocation7 + $0x4c4] ss:$16 sps:$4 sm:$0xff]   ;;  %v3184_v31 = vld [vmem:[#allocation7 + $0x560] ss:$16 sps:$4 sm:$0xff]  }
  0x63   :  { %v3162_v1 = vld [vmem:[#allocation7 + $0x4e4] ss:$16 sps:$4 sm:$0xff]   ;;  %v3220_v12 = vld [vmem:[#allocation4 + $0x40] ss:$14 sps:$4 sm:$0xff]  }
  0x64   :  { %1710 = vmatpush1.bf16.msra.mxu1 %v3074_v45  ;;  %v3130_v45 = vld [vmem:[#allocation7 + $0x440] ss:$16 sps:$4 sm:$0xff]   ;;  %v3168_v5 = vld [vmem:[#allocation7 + $0x504] ss:$16 sps:$4 sm:$0xff]  }
  0x65   :  { %1753 = vmatpush1.bf16.msra.mxu0 %v3075_v46  ;;  %1711 = vmatprep.subr.bf16.mxu1 %v3076_v49  ;;  %v3133_v46 = vld [vmem:[#allocation7 + $0x48] ss:$16 sps:$4 sm:$0xff]   ;;  %v3141_v49 = vld [vmem:[#allocation7 + $0x6c] ss:$16 sps:$4 sm:$0xff]   ;;  %v3186_v29 = vld [vmem:[#allocation7 + $0x564] ss:$16 sps:$4 sm:$0xff]  }
  0x66   :  { %1754 = vmatprep.subr.bf16.mxu0 %v3078_v50  ;;  %v3136_v50 = vld [vmem:[#allocation7 + $0x460] ss:$16 sps:$4 sm:$0xff]   ;;  %v3214_v7 = vld [vmem:[#allocation4 + $0x8] ss:$14 sps:$4 sm:$0xff]  }
  0x67   :  { %v3673_v10 = vrot.slane %v3214_v7, %v3653_v55  ;;  %v3244_v7 = vld [vmem:[#allocation7 + $0x660] ss:$16 sps:$4 sm:$0xff]  }
  0x68   :  { %1712 = vmatpush1.bf16.msra.mxu1 %v3080_v51  ;;  %v3139_v51 = vld [vmem:[#allocation7 + $0x68] ss:$16 sps:$4 sm:$0xff]  }
  0x69   :  { %1755 = vmatpush1.bf16.msra.mxu0 %v3081_v52  ;;  %1713 = vmatprep.subr.bf16.mxu1 %v3082_v53  ;;  %v3144_v52 = vld [vmem:[#allocation7 + $0x484] ss:$16 sps:$4 sm:$0xff]   ;;  %v3147_v53 = vld [vmem:[#allocation7 + $0x8c] ss:$16 sps:$4 sm:$0xff]  }
  0x6a   :  { %1756 = vmatprep.subr.bf16.mxu0 %v3084_v54  ;;  %v3142_v54 = vld [vmem:[#allocation7 + $0x480] ss:$16 sps:$4 sm:$0xff]  }
  0x6c   :  { %1714 = vmatpush1.bf16.msra.mxu1 %v3086_v58  ;;  %v3153_v58 = vld [vmem:[#allocation7 + $0xac] ss:$16 sps:$4 sm:$0xff]  }
  0x6d   :  { %1757 = vmatpush1.bf16.msra.mxu0 %v3087_v59  ;;  %1715 = vmatprep.subr.bf16.mxu1 %v3088_v4  ;;  %v3148_v59 = vld [vmem:[#allocation7 + $0x4a0] ss:$16 sps:$4 sm:$0xff]   ;;  %v3163_v4 = vld [vmem:[#allocation7 + $0xe8] ss:$16 sps:$4 sm:$0xff]  }
  0x6e   :  { %1758 = vmatprep.subr.bf16.mxu0 %v3090_v8  ;;  %v3217_v8 = vld [vmem:[#allocation4 + $0x24] ss:$14 sps:$4 sm:$0xff]  }
  0x6f   :  { %v3676_v11 = vrot.slane %v3217_v8, %v3653_v55  ;;  %v3247_v8 = vld [vmem:[#allocation7 + $0x268] ss:$16 sps:$4 sm:$0xff]  }
  0x70   :  { %1716 = vmatpush1.bf16.msra.mxu1 %v3092_v14  ;;  %v3223_v14 = vld [vmem:[#allocation4 + $0x5c] ss:$14 sps:$4 sm:$0xff]  }
  0x71   :  { %1759 = vmatpush1.bf16.msra.mxu0 %v3093_v15  ;;  %1717 = vmatprep.subr.bf16.mxu1 %v3094_v17  ;;  %v3174_v15 = vld [vmem:[#allocation7 + $0x524] ss:$16 sps:$4 sm:$0xff]   ;;  %v3679_v17 = vrot.slane %v3220_v12, %v3653_v55  ;;  %v3684_v19 = vrot.slane %v3223_v14, %v3653_v55  ;;  %v3216_v12 = vld [vmem:[#allocation4 + $0xc] ss:$14 sps:$4 sm:$0x33]  }
  0x72   :  { %1760 = vmatprep.subr.bf16.mxu0 %v3096_v20  ;;  %v3172_v20 = vld [vmem:[#allocation7 + $0x520] ss:$16 sps:$4 sm:$0xff]  }
  0x73   :  { %v3222_v14 = vld [vmem:[#allocation4 + $0x44] ss:$14 sps:$4 sm:$0x33]  }
  0x74   :  { %1718 = vmatpush1.bf16.msra.mxu1 %v3098_v22  ;;  %v3175_v22 = vld [vmem:[#allocation7 + $0x128] ss:$16 sps:$4 sm:$0xff]  }
  0x75   :  { %1761 = vmatpush1.bf16.msra.mxu0 %v3099_v23  ;;  %1719 = vmatprep.subr.bf16.mxu1 %v3100_v24  ;;  %v300_v23 = vcombine.high %v3679_v17, %v3684_v19  ;;  %v3180_v24 = vld [vmem:[#allocation7 + $0x544] ss:$16 sps:$4 sm:$0xff]  }
  0x76   :  { %1762 = vmatprep.subr.bf16.mxu0 %v3102_v25  ;;  %v3183_v25 = vld [vmem:[#allocation7 + $0x14c] ss:$16 sps:$4 sm:$0xff]  }
  0x78   :  { %1720 = vmatpush1.bf16.msra.mxu1 %v3104_v26 }
  0x79   :  { %1763 = vmatpush1.bf16.msra.mxu0 %v3105_v27  ;;  %1861 = vmatprep.subr.bf16.mxu1 %v3123_v33  ;;  %v3178_v27 = vld [vmem:[#allocation7 + $0x540] ss:$16 sps:$4 sm:$0xff]   ;;  %v3192_v33 = vld [vmem:[#allocation7 + $0x584] ss:$16 sps:$4 sm:$0xff]  }
  0x7a   :  { %1775 = vmatprep.subr.bf16.mxu0 %v3120_v32  ;;  %v3187_v32 = vld [vmem:[#allocation7 + $0x168] ss:$16 sps:$4 sm:$0xff]  }
  0x7b   :  { %1722 = vmatmul.mubr.bf16.vlgmr.msra.gmra.mrb[0].mxu1 %v3666_v34 }
  0x7c   :  { %1765 = vmatmul.mubr.bf16.vlgmr.msra.gmra.mrb[0].mxu0 %v3668_v37  ;;  %1862 = vmatpush1.bf16.msra.mxu1 %v3121_v36  ;;  %v3190_v36 = vld [vmem:[#allocation7 + $0x580] ss:$16 sps:$4 sm:$0xff]  }
  0x7d   :  { %1776 = vmatpush1.bf16.msra.mxu0 %v3118_v35  ;;  %1863 = vmatprep.subr.bf16.mxu1 %v3129_v40  ;;  %v3195_v35 = vld [vmem:[#allocation7 + $0x18c] ss:$16 sps:$4 sm:$0xff]   ;;  %v3198_v40 = vld [vmem:[#allocation7 + $0x5a4] ss:$16 sps:$4 sm:$0xff]  }
  0x7e   :  { %1777 = vmatprep.subr.bf16.mxu0 %v3126_v38  ;;  %1893 = vmatprep.mubr.bf16.mxu1 %v339_v18  ;;  %v229_v18 = vcombine.high %v3673_v10, %v3676_v11  ;;  %v3193_v38 = vld [vmem:[#allocation7 + $0x188] ss:$16 sps:$4 sm:$0xff]  }
  0x80   :  { %1864 = vmatpush1.bf16.msra.mxu1 %v3127_v42  ;;  %v3688_v26 = vpack.c.bf16 %v300_v23, %v229_v18  ;;  %v3196_v42 = vld [vmem:[#allocation7 + $0x5a0] ss:$16 sps:$4 sm:$0xff]   ;;  %v122_v18 = vand.u32 127, %v76_v39  ;;  %v3267_v23 = vld [vmem:[#allocation7 + $0x2cc] ss:$16 sps:$4 sm:$0xff]  }
  0x81   :  { %1778 = vmatpush1.bf16.msra.mxu0 %v3124_v41  ;;  %1865 = vmatprep.subr.bf16.mxu1 %v3135_v44  ;;  %v3201_v41 = vld [vmem:[#allocation7 + $0x1ac] ss:$16 sps:$4 sm:$0xff]   ;;  %v3204_v44 = vld [vmem:[#allocation7 + $0x5c4] ss:$16 sps:$4 sm:$0xff]   ;;  %v3265_v39 = vld [vmem:[#allocation7 + $0x2c8] ss:$16 sps:$4 sm:$0xff]  }
  0x82   :  { %1779 = vmatprep.subr.bf16.mxu0 %v3132_v43  ;;  %1807 = vmatprep.mubr.bf16.mxu0 %v3688_v26  ;;  %v3199_v43 = vld [vmem:[#allocation7 + $0x1a8] ss:$16 sps:$4 sm:$0xff]  }
  0x84   :  { %1866 = vmatpush1.bf16.msra.mxu1 %v3133_v46  ;;  %v3202_v46 = vld [vmem:[#allocation7 + $0x5c0] ss:$16 sps:$4 sm:$0xff]  }
  0x85   :  { %1780 = vmatpush1.bf16.msra.mxu0 %v3130_v45  ;;  %1867 = vmatprep.subr.bf16.mxu1 %v3141_v49  ;;  %v3207_v45 = vld [vmem:[#allocation7 + $0x1cc] ss:$16 sps:$4 sm:$0xff]   ;;  %v3210_v49 = vld [vmem:[#allocation7 + $0x5e4] ss:$16 sps:$4 sm:$0xff]  }
  0x86   :  { %1781 = vmatprep.subr.bf16.mxu0 %v3138_v48  ;;  %v3205_v48 = vld [vmem:[#allocation7 + $0x1c8] ss:$16 sps:$4 sm:$0xff]  }
  0x88   :  { %1868 = vmatpush1.bf16.msra.mxu1 %v3139_v51  ;;  %v3208_v51 = vld [vmem:[#allocation7 + $0x5e0] ss:$16 sps:$4 sm:$0xff]  }
  0x89   :  { %1782 = vmatpush1.bf16.msra.mxu0 %v3136_v50  ;;  %1869 = vmatprep.subr.bf16.mxu1 %v3147_v53  ;;  %v3213_v50 = vld [vmem:[#allocation7 + $0x1ec] ss:$16 sps:$4 sm:$0xff]   ;;  %v299_v53 = vcombine.low %v3679_v17, %v3684_v19  ;;  %v3256_v19 = vld [vmem:[#allocation7 + $0x6a0] ss:$16 sps:$4 sm:$0xff]  }
  0x8a   :  { %1783 = vmatprep.subr.bf16.mxu0 %v3144_v52  ;;  %v228_v52 = vcombine.low %v3673_v10, %v3676_v11  ;;  %v3255_v10 = vld [vmem:[#allocation7 + $0x28c] ss:$16 sps:$4 sm:$0xff]   ;;  %v3250_v11 = vld [vmem:[#allocation7 + $0x680] ss:$16 sps:$4 sm:$0xff]  }
  0x8b   :  { %v3225_v17 = vld [vmem:[#allocation4 + $0x60] ss:$14 sps:$4 sm:$0x33]  }
  0x8c   :  { %1870 = vmatpush1.bf16.msra.mxu1 %v3145_v56  ;;  %v3228_v56 = vld [vmem:[#allocation7 + $0x604] ss:$16 sps:$4 sm:$0xff]  }
  0x8d   :  { %1784 = vmatpush1.bf16.msra.mxu0 %v3142_v54  ;;  %1871 = vmatprep.subr.bf16.mxu1 %v3153_v58  ;;  %v3211_v54 = vld [vmem:[#allocation7 + $0x1e8] ss:$16 sps:$4 sm:$0xff]   ;;  %v3226_v58 = vld [vmem:[#allocation7 + $0x600] ss:$16 sps:$4 sm:$0xff]  }
  0x8e   :  { %1785 = vmatprep.subr.bf16.mxu0 %v3150_v57  ;;  %v3231_v57 = vld [vmem:[#allocation7 + $0x20c] ss:$16 sps:$4 sm:$0xff]  }
  0x90   :  { %1872 = vmatpush1.bf16.msra.mxu1 %v3151_v60  ;;  %v3229_v60 = vld [vmem:[#allocation7 + $0x208] ss:$16 sps:$4 sm:$0xff]  }
  0x91   :  { %1786 = vmatpush1.bf16.msra.mxu0 %v3148_v59  ;;  %1873 = vmatprep.subr.bf16.mxu1 %v3159_v62  ;;  %v3695_v59 = vpack.c.bf16 %v299_v53, %v228_v52  ;;  %v3237_v62 = vld [vmem:[#allocation7 + $0x22c] ss:$16 sps:$4 sm:$0xff]   ;;  %v3280_v52 = vld [vmem:[#allocation7 + $0x348] ss:$16 sps:$4 sm:$0xff]  }
  0x92   :  { %1787 = vmatprep.subr.bf16.mxu0 %v3156_v61  ;;  %v3234_v61 = vld [vmem:[#allocation7 + $0x624] ss:$16 sps:$4 sm:$0xff]   ;;  %v3285_v53 = vld [vmem:[#allocation7 + $0x36c] ss:$16 sps:$4 sm:$0xff]  }
  0x94   :  { %1874 = vmatpush1.bf16.msra.mxu1 %v3157_v0  ;;  %v3235_v0 = vld [vmem:[#allocation7 + $0x228] ss:$16 sps:$4 sm:$0xff]  }
  0x95   :  { %1788 = vmatpush1.bf16.msra.mxu0 %v3154_v63  ;;  %1875 = vmatprep.subr.bf16.mxu1 %v3165_v2  ;;  %v3232_v63 = vld [vmem:[#allocation7 + $0x620] ss:$16 sps:$4 sm:$0xff]   ;;  %v3243_v2 = vld [vmem:[#allocation7 + $0x24c] ss:$16 sps:$4 sm:$0xff]  }
  0x96   :  { %1789 = vmatprep.subr.bf16.mxu0 %v3162_v1  ;;  %v3240_v1 = vld [vmem:[#allocation7 + $0x644] ss:$16 sps:$4 sm:$0xff]  }
  0x98   :  { %1876 = vmatpush1.bf16.msra.mxu1 %v3163_v4  ;;  %v3238_v4 = vld [vmem:[#allocation7 + $0x640] ss:$16 sps:$4 sm:$0xff]  }
  0x99   :  { %1790 = vmatpush1.bf16.msra.mxu0 %v3160_v3  ;;  %1877 = vmatprep.subr.bf16.mxu1 %v3171_v6  ;;  %v3570_v3 = vmov 0   ;;  %v3249_v6 = vld [vmem:[#allocation7 + $0x26c] ss:$16 sps:$4 sm:$0xff]  }
  0x9a   :  { %1791 = vmatprep.subr.bf16.mxu0 %v3168_v5  ;;  %v3241_v5 = vld [vmem:[#allocation7 + $0x248] ss:$16 sps:$4 sm:$0xff]  }
  0x9c   :  { %1878 = vmatpush1.bf16.msra.mxu1 %v3169_v13  ;;  %v3219_v13 = vld [vmem:[#allocation4 + $0x28] ss:$14 sps:$4 sm:$0x33]  }
  0x9d   :  { %1792 = vmatpush1.bf16.msra.mxu0 %v3166_v9  ;;  %1879 = vmatprep.subr.bf16.mxu1 %v3177_v16  ;;  %v3252_v9 = vld [vmem:[#allocation7 + $0x684] ss:$16 sps:$4 sm:$0xff]   ;;  %v3261_v16 = vld [vmem:[#allocation7 + $0x2ac] ss:$16 sps:$4 sm:$0xff]  }
  0x9e   :  { %1793 = vmatprep.subr.bf16.mxu0 %v3174_v15  ;;  %v3258_v15 = vld [vmem:[#allocation7 + $0x6a4] ss:$16 sps:$4 sm:$0xff]  }
  0xa0   :  { %1880 = vmatpush1.bf16.msra.mxu1 %v3175_v22  ;;  %v3264_v22 = vld [vmem:[#allocation7 + $0x6c4] ss:$16 sps:$4 sm:$0xff]  }
  0xa1   :  { %1794 = vmatpush1.bf16.msra.mxu0 %v3172_v20  ;;  %1881 = vmatprep.subr.bf16.mxu1 %v3183_v25  ;;  %v3259_v20 = vld [vmem:[#allocation7 + $0x2a8] ss:$16 sps:$4 sm:$0xff]   ;;  %v213_v25 = vrot.slane %v3216_v12, %v3653_v55  ;;  %v3396_v12 = vld [vmem:[#allocation9 + $0x84] ss:$8 sps:$4 sm:$0xff]  }
  0xa2   :  { %1795 = vmatprep.subr.bf16.mxu0 %v3180_v24  ;;  %v128_v24 = vadd.s32 768, %v122_v18  ;;  %v3306_v18 = vld [vmem:[#allocation7 + $0x44c] ss:$16 sps:$4 sm:$0xff]  }
  0xa4   :  { %1882 = vmatpush1.bf16.msra.mxu1 %v3181_v28  ;;  %v284_v28 = vrot.slane %v3222_v14, %v3653_v55  ;;  %vm143_vm0 = vcmp.lt.s32.totalorder %v128_v24, 784  ;;  %v3303_v14 = vld [vmem:[#allocation7 + $0x42c] ss:$16 sps:$4 sm:$0xff]   ;;  %v3400_v24 = vld [vmem:[#allocation9 + $0xa0] ss:$8 sps:$4 sm:$0xff]  }
  0xa5   :  { %1796 = vmatpush1.bf16.msra.mxu0 %v3178_v27  ;;  %1883 = vmatprep.subr.bf16.mxu1 %v3189_v30  ;;  %v227_v27 = vrot.slane %v3219_v13, %v3653_v55  ;;  %v3262_v30 = vld [vmem:[#allocation7 + $0x6c0] ss:$16 sps:$4 sm:$0xff]   ;;  %vm3706_vm1 = vmpackc.low %vm143_vm0, %vm143_vm0  ;;  %v3298_v13 = vld [vmem:[#allocation7 + $0x408] ss:$16 sps:$4 sm:$0xff]  }
  0xa6   :  { %1797 = vmatprep.subr.bf16.mxu0 %v3186_v29  ;;  %v298_v29 = vrot.slane %v3225_v17, %v3653_v55  ;;  %v3301_v17 = vld [vmem:[#allocation7 + $0x428] ss:$16 sps:$4 sm:$0xff]  }
  0xa8   :  { %1884 = vmatpush1.bf16.msra.mxu1 %v3187_v32  ;;  %v3273_v32 = vld [vmem:[#allocation7 + $0x2ec] ss:$16 sps:$4 sm:$0xff]  }
  0xa9   :  { %1798 = vmatpush1.bf16.msra.mxu0 %v3184_v31  ;;  %1885 = vmatprep.subr.bf16.mxu1 %v3195_v35  ;;  %v3270_v31 = vld [vmem:[#allocation7 + $0x6e4] ss:$16 sps:$4 sm:$0xff]   ;;  %v230_v35 = vcombine.low %v213_v25, %v227_v27  ;;  %v3307_v25 = vld [vmem:[#allocation7 + $0x468] ss:$16 sps:$4 sm:$0xff]   ;;  %v3312_v27 = vld [vmem:[#allocation7 + $0x48c] ss:$16 sps:$4 sm:$0xff]  }
  0xaa   :  { %1799 = vmatprep.subr.bf16.mxu0 %v3192_v33  ;;  %v3268_v33 = vld [vmem:[#allocation7 + $0x6e0] ss:$16 sps:$4 sm:$0xff]  }
  0xac   :  { %1886 = vmatpush1.bf16.msra.mxu1 %v3193_v38  ;;  %v3271_v38 = vld [vmem:[#allocation7 + $0x2e8] ss:$16 sps:$4 sm:$0xff]  }
  0xad   :  { %1800 = vmatpush1.bf16.msra.mxu0 %v3190_v36  ;;  %1887 = vmatprep.subr.bf16.mxu1 %v3201_v41  ;;  %v301_v36 = vcombine.low %v284_v28, %v298_v29  ;;  %v3408_v28 = vld [vmem:[#allocation9 + $0xc4] ss:$8 sps:$4 sm:$0xff]   ;;  %v3310_v29 = vld [vmem:[#allocation7 + $0x488] ss:$16 sps:$4 sm:$0xff]  }
  0xae   :  { %1801 = vmatprep.subr.bf16.mxu0 %v3198_v40  ;;  %v3276_v40 = vld [vmem:[#allocation7 + $0x30c] ss:$16 sps:$4 sm:$0xff]  }
  0xaf   :  { %v3710_v41 = vpack.c.bf16 %v301_v36, %v230_v35  ;;  %v3321_v35 = vld [vmem:[#allocation7 + $0x4ec] ss:$16 sps:$4 sm:$0xff]   ;;  %v3319_v36 = vld [vmem:[#allocation7 + $0x4e8] ss:$16 sps:$4 sm:$0xff]  }
  0xb0   :  { %1888 = vmatpush1.bf16.msra.mxu1 %v3199_v43  ;;  %v3279_v43 = vld [vmem:[#allocation7 + $0x32c] ss:$16 sps:$4 sm:$0xff]  }
  0xb1   :  { %1802 = vmatpush1.bf16.msra.mxu0 %v3196_v42  ;;  %1889 = vmatprep.subr.bf16.mxu1 %v3207_v45  ;;  %v3274_v42 = vld [vmem:[#allocation7 + $0x308] ss:$16 sps:$4 sm:$0xff]   ;;  %v3372_v45 = vld [vmem:[#allocation9 + $0x4] ss:$8 sps:$4 sm:$0xff]  }
  0xb2   :  { %1803 = vmatprep.subr.bf16.mxu0 %v3204_v44  ;;  %v3370_v44 = vld [vmem:[#allocation9] ss:$8 sps:$4 sm:$0xff]  }
  0xb4   :  { %1890 = vmatpush1.bf16.msra.mxu1 %v3205_v48  ;;  %v3375_v48 = vld [vmem:[#allocation9 + $0x14] ss:$8 sps:$4 sm:$0xff]  }
  0xb5   :  { %1804 = vmatpush1.bf16.msra.mxu0 %v3202_v46  ;;  %1891 = vmatprep.subr.bf16.mxu1 %v3213_v50  ;;  %v3277_v46 = vld [vmem:[#allocation7 + $0x328] ss:$16 sps:$4 sm:$0xff]  }
  0xb6   :  { %1805 = vmatprep.subr.bf16.mxu0 %v3210_v49  ;;  %v3282_v49 = vld [vmem:[#allocation7 + $0x34c] ss:$16 sps:$4 sm:$0xff]   ;;  %v3373_v50 = vld [vmem:[#allocation9 + $0x10] ss:$8 sps:$4 sm:$0xff]  }
  0xb8   :  { %1892 = vmatpush1.bf16.msra.mxu1 %v3211_v54  ;;  %v3376_v54 = vld [vmem:[#allocation9 + $0x20] ss:$8 sps:$4 sm:$0xff]  }
  0xb9   :  { %1806 = vmatpush1.bf16.msra.mxu0 %v3208_v51  ;;  %1904 = vmatprep.subr.bf16.mxu1 %v3231_v57  ;;  %v3378_v51 = vld [vmem:[#allocation9 + $0x24] ss:$8 sps:$4 sm:$0xff]   ;;  %v3283_v57 = vld [vmem:[#allocation7 + $0x368] ss:$16 sps:$4 sm:$0xff]  }
  0xba   :  { %1818 = vmatprep.subr.bf16.mxu0 %v3228_v56  ;;  %v3381_v56 = vld [vmem:[#allocation9 + $0x34] ss:$8 sps:$4 sm:$0xff]  }
  0xbb   :  { %1894 = vmatmul.mubr.bf16.vlgmr.msra.gmra.mrb[4].mxu1 %v3666_v34  ;;  %v3246_v34 = vld [vmem:[#allocation7 + $0x664] ss:$16 sps:$4 sm:$0xff]  }
  0xbc   :  { %1808 = vmatmul.mubr.bf16.vlgmr.msra.gmra.mrb[0].mxu0 %v3695_v59  ;;  %1905 = vmatpush1.bf16.msra.mxu1 %v3229_v60  ;;  %v3379_v60 = vld [vmem:[#allocation9 + $0x30] ss:$8 sps:$4 sm:$0xff]  }
  0xbd   :  { %1819 = vmatpush1.bf16.msra.mxu0 %v3226_v58  ;;  %1906 = vmatprep.subr.bf16.mxu1 %v3237_v62  ;;  %v3288_v58 = vld [vmem:[#allocation7 + $0x38c] ss:$16 sps:$4 sm:$0xff]   ;;  %v3286_v62 = vld [vmem:[#allocation7 + $0x388] ss:$16 sps:$4 sm:$0xff]  }
  0xbe   :  { %1820 = vmatprep.subr.bf16.mxu0 %v3234_v61  ;;  %1850 = vmatprep.mubr.bf16.mxu0 %v3570_v3  ;;  %v3384_v61 = vld [vmem:[#allocation9 + $0x44] ss:$8 sps:$4 sm:$0xff]  }
  0xbf   :  { %1936 = vmatprep.mubr.bf16.mxu1 %v3663_v21  ;;  %v3253_v21 = vld [vmem:[#allocation7 + $0x288] ss:$16 sps:$4 sm:$0xff]  }
  0xc0   :  { %1907 = vmatpush1.bf16.msra.mxu1 %v3235_v0  ;;  %v3382_v0 = vld [vmem:[#allocation9 + $0x40] ss:$8 sps:$4 sm:$0xff]  }
  0xc1   :  { %1821 = vmatpush1.bf16.msra.mxu0 %v3232_v63  ;;  %1908 = vmatprep.subr.bf16.mxu1 %v3243_v2  ;;  %v3291_v63 = vld [vmem:[#allocation7 + $0x3ac] ss:$16 sps:$4 sm:$0xff]   ;;  %v3289_v2 = vld [vmem:[#allocation7 + $0x3a8] ss:$16 sps:$4 sm:$0xff]  }
  0xc2   :  { %1822 = vmatprep.subr.bf16.mxu0 %v3240_v1  ;;  %v3387_v1 = vld [vmem:[#allocation9 + $0x54] ss:$8 sps:$4 sm:$0xff]  }
  0xc4   :  { %1909 = vmatpush1.bf16.msra.mxu1 %v3241_v5  ;;  %v3385_v5 = vld [vmem:[#allocation9 + $0x50] ss:$8 sps:$4 sm:$0xff]  }
  0xc5   :  { %1823 = vmatpush1.bf16.msra.mxu0 %v3238_v4  ;;  %1910 = vmatprep.subr.bf16.mxu1 %v3249_v6  ;;  %v3294_v4 = vld [vmem:[#allocation7 + $0x3cc] ss:$16 sps:$4 sm:$0xff]   ;;  %v3292_v6 = vld [vmem:[#allocation7 + $0x3c8] ss:$16 sps:$4 sm:$0xff]  }
  0xc6   :  { %1824 = vmatprep.subr.bf16.mxu0 %v3246_v34  ;;  %v3390_v34 = vld [vmem:[#allocation9 + $0x64] ss:$8 sps:$4 sm:$0xff]  }
  0xc8   :  { %1911 = vmatpush1.bf16.msra.mxu1 %v3247_v8  ;;  %v3388_v8 = vld [vmem:[#allocation9 + $0x60] ss:$8 sps:$4 sm:$0xff]  }
  0xc9   :  { %1825 = vmatpush1.bf16.msra.mxu0 %v3244_v7  ;;  %1912 = vmatprep.subr.bf16.mxu1 %v3255_v10  ;;  %v3297_v7 = vld [vmem:[#allocation7 + $0x3ec] ss:$16 sps:$4 sm:$0xff]   ;;  %v3295_v10 = vld [vmem:[#allocation7 + $0x3e8] ss:$16 sps:$4 sm:$0xff]  }
  0xca   :  { %1826 = vmatprep.subr.bf16.mxu0 %v3252_v9  ;;  %v3393_v9 = vld [vmem:[#allocation9 + $0x74] ss:$8 sps:$4 sm:$0xff]  }
  0xcc   :  { %1913 = vmatpush1.bf16.msra.mxu1 %v3253_v21  ;;  %v3391_v21 = vld [vmem:[#allocation9 + $0x70] ss:$8 sps:$4 sm:$0xff]  }
  0xcd   :  { %1827 = vmatpush1.bf16.msra.mxu0 %v3250_v11  ;;  %1914 = vmatprep.subr.bf16.mxu1 %v3261_v16  ;;  %v3300_v11 = vld [vmem:[#allocation7 + $0x40c] ss:$16 sps:$4 sm:$0xff]  }
  0xce   :  { %1828 = vmatprep.subr.bf16.mxu0 %v3258_v15  ;;  %v3394_v15 = vld [vmem:[#allocation9 + $0x80] ss:$8 sps:$4 sm:$0xff]   ;;  %v3399_v16 = vld [vmem:[#allocation9 + $0x94] ss:$8 sps:$4 sm:$0xff]  }
  0xd0   :  { %1915 = vmatpush1.bf16.msra.mxu1 %v3259_v20  ;;  %v3402_v20 = vld [vmem:[#allocation9 + $0xa4] ss:$8 sps:$4 sm:$0xff]  }
  0xd1   :  { %1829 = vmatpush1.bf16.msra.mxu0 %v3256_v19  ;;  %1916 = vmatprep.subr.bf16.mxu1 %v3267_v23  ;;  %v3397_v19 = vld [vmem:[#allocation9 + $0x90] ss:$8 sps:$4 sm:$0xff]   ;;  %v3309_v23 = vld [vmem:[#allocation7 + $0x46c] ss:$16 sps:$4 sm:$0xff]  }
  0xd2   :  { %1830 = vmatprep.subr.bf16.mxu0 %v3264_v22  ;;  %v3304_v22 = vld [vmem:[#allocation7 + $0x448] ss:$16 sps:$4 sm:$0xff]  }
  0xd4   :  { %1917 = vmatpush1.bf16.msra.mxu1 %v3265_v39  ;;  %v3406_v39 = vld [vmem:[#allocation9 + $0xc0] ss:$8 sps:$4 sm:$0xff]  }
  0xd5   :  { %1831 = vmatpush1.bf16.msra.mxu0 %v3262_v30  ;;  %1918 = vmatprep.subr.bf16.mxu1 %v3273_v32  ;;  %v3315_v30 = vld [vmem:[#allocation7 + $0x4ac] ss:$16 sps:$4 sm:$0xff]  }
  0xd6   :  { %1832 = vmatprep.subr.bf16.mxu0 %v3270_v31  ;;  %v3313_v31 = vld [vmem:[#allocation7 + $0x4a8] ss:$16 sps:$4 sm:$0xff]   ;;  %v3318_v32 = vld [vmem:[#allocation7 + $0x4cc] ss:$16 sps:$4 sm:$0xff]  }
  0xd8   :  { %1919 = vmatpush1.bf16.msra.mxu1 %v3271_v38  ;;  %v3324_v38 = vld [vmem:[#allocation7 + $0x50c] ss:$16 sps:$4 sm:$0xff]  }
  0xd9   :  { %1833 = vmatpush1.bf16.msra.mxu0 %v3268_v33  ;;  %1920 = vmatprep.subr.bf16.mxu1 %v3276_v40  ;;  %v3316_v33 = vld [vmem:[#allocation7 + $0x4c8] ss:$16 sps:$4 sm:$0xff]  }
  0xda   :  { %2484 = vmatprep.subr.bf16.mxu0 %v3372_v45  ;;  %v3322_v40 = vld [vmem:[#allocation7 + $0x508] ss:$16 sps:$4 sm:$0xff]  }
  0xdb   :  { %v3328_v45 = vld [vmem:[#allocation7 + $0x548] ss:$16 sps:$4 sm:$0xff]  }
  0xdc   :  { %2896 = vmatmul.mubr.msk.bf16.vlgmr.msra.gmra.mrb[0].mxu0 %vm3706_vm1, %v3710_v41  ;;  %1921 = vmatpush1.bf16.msra.mxu1 %v3274_v42  ;;  %v3327_v42 = vld [vmem:[#allocation7 + $0x52c] ss:$16 sps:$4 sm:$0xff]  }
  0xdd   :  { %1922 = vmatprep.subr.bf16.mxu1 %v3279_v43  ;;  %2485 = vmatpush1.bf16.msra.mxu0 %v3370_v44  ;;  %v3325_v43 = vld [vmem:[#allocation7 + $0x528] ss:$16 sps:$4 sm:$0xff]   ;;  %v3330_v44 = vld [vmem:[#allocation7 + $0x54c] ss:$16 sps:$4 sm:$0xff]  }
  0xde   :  { %2486 = vmatprep.subr.bf16.mxu0 %v3375_v48  ;;  %v3331_v48 = vld [vmem:[#allocation7 + $0x568] ss:$16 sps:$4 sm:$0xff]  }
  0xe0   :  { %1923 = vmatpush1.bf16.msra.mxu1 %v3277_v46  ;;  %v3333_v46 = vld [vmem:[#allocation7 + $0x56c] ss:$16 sps:$4 sm:$0xff]  }
  0xe1   :  { %1924 = vmatprep.subr.bf16.mxu1 %v3282_v49  ;;  %2487 = vmatpush1.bf16.msra.mxu0 %v3373_v50  ;;  %v3336_v49 = vld [vmem:[#allocation7 + $0x58c] ss:$16 sps:$4 sm:$0xff]   ;;  %v3334_v50 = vld [vmem:[#allocation7 + $0x588] ss:$16 sps:$4 sm:$0xff]  }
  0xe2   :  { %2488 = vmatprep.subr.bf16.mxu0 %v3378_v51  ;;  %v3339_v51 = vld [vmem:[#allocation7 + $0x5ac] ss:$16 sps:$4 sm:$0xff]  }
  0xe4   :  { %1925 = vmatpush1.bf16.msra.mxu1 %v3280_v52  ;;  %v3337_v52 = vld [vmem:[#allocation7 + $0x5a8] ss:$16 sps:$4 sm:$0xff]  }
  0xe5   :  { %1926 = vmatprep.subr.bf16.mxu1 %v3285_v53  ;;  %2489 = vmatpush1.bf16.msra.mxu0 %v3376_v54  ;;  %v3342_v53 = vld [vmem:[#allocation7 + $0x5cc] ss:$16 sps:$4 sm:$0xff]  }
  0xe6   :  { %2490 = vmatprep.subr.bf16.mxu0 %v3381_v56  ;;  %v3411_v54 = vld [vmem:[#allocation9 + $0xd4] ss:$8 sps:$4 sm:$0xff]   ;;  %v3409_v56 = vld [vmem:[#allocation9 + $0xd0] ss:$8 sps:$4 sm:$0xff]  }
  0xe8   :  { %1927 = vmatpush1.bf16.msra.mxu1 %v3283_v57  ;;  %v3340_v57 = vld [vmem:[#allocation7 + $0x5c8] ss:$16 sps:$4 sm:$0xff]  }
  0xe9   :  { %1928 = vmatprep.subr.bf16.mxu1 %v3288_v58  ;;  %2491 = vmatpush1.bf16.msra.mxu0 %v3379_v60  ;;  %v3345_v58 = vld [vmem:[#allocation7 + $0x5ec] ss:$16 sps:$4 sm:$0xff]  }
  0xea   :  { %2492 = vmatprep.subr.bf16.mxu0 %v3384_v61  ;;  %v3414_v60 = vld [vmem:[#allocation9 + $0xe4] ss:$8 sps:$4 sm:$0xff]   ;;  %v3412_v61 = vld [vmem:[#allocation9 + $0xe0] ss:$8 sps:$4 sm:$0xff]  }
  0xec   :  { %1929 = vmatpush1.bf16.msra.mxu1 %v3286_v62  ;;  %v3343_v62 = vld [vmem:[#allocation7 + $0x5e8] ss:$16 sps:$4 sm:$0xff]  }
  0xed   :  { %1930 = vmatprep.subr.bf16.mxu1 %v3291_v63  ;;  %2493 = vmatpush1.bf16.msra.mxu0 %v3382_v0  ;;  %v3348_v63 = vld [vmem:[#allocation7 + $0x60c] ss:$16 sps:$4 sm:$0xff]  }
  0xee   :  { %2494 = vmatprep.subr.bf16.mxu0 %v3387_v1  ;;  %v3417_v0 = vld [vmem:[#allocation9 + $0xf4] ss:$8 sps:$4 sm:$0xff]   ;;  %v3415_v1 = vld [vmem:[#allocation9 + $0xf0] ss:$8 sps:$4 sm:$0xff]  }
  0xf0   :  { %1931 = vmatpush1.bf16.msra.mxu1 %v3289_v2  ;;  %v3346_v2 = vld [vmem:[#allocation7 + $0x608] ss:$16 sps:$4 sm:$0xff]  }
  0xf1   :  { %1932 = vmatprep.subr.bf16.mxu1 %v3294_v4  ;;  %2495 = vmatpush1.bf16.msra.mxu0 %v3385_v5  ;;  %v3351_v4 = vld [vmem:[#allocation7 + $0x62c] ss:$16 sps:$4 sm:$0xff]   ;;  %v3349_v5 = vld [vmem:[#allocation7 + $0x628] ss:$16 sps:$4 sm:$0xff]  }
  0xf2   :  { %2496 = vmatprep.subr.bf16.mxu0 %v3390_v34  ;;  %v3420_v34 = vld [vmem:[#allocation9 + $0x104] ss:$8 sps:$4 sm:$0xff]  }
  0xf4   :  { %1933 = vmatpush1.bf16.msra.mxu1 %v3292_v6  ;;  %v3354_v6 = vld [vmem:[#allocation7 + $0x64c] ss:$16 sps:$4 sm:$0xff]  }
  0xf5   :  { %1934 = vmatprep.subr.bf16.mxu1 %v3297_v7  ;;  %2497 = vmatpush1.bf16.msra.mxu0 %v3388_v8  ;;  %v3352_v7 = vld [vmem:[#allocation7 + $0x648] ss:$16 sps:$4 sm:$0xff]   ;;  %v3357_v8 = vld [vmem:[#allocation7 + $0x66c] ss:$16 sps:$4 sm:$0xff]  }
  0xf6   :  { %2498 = vmatprep.subr.bf16.mxu0 %v3393_v9  ;;  %v3355_v9 = vld [vmem:[#allocation7 + $0x668] ss:$16 sps:$4 sm:$0xff]  }
  0xf8   :  { %1935 = vmatpush1.bf16.msra.mxu1 %v3295_v10  ;;  %v3360_v10 = vld [vmem:[#allocation7 + $0x68c] ss:$16 sps:$4 sm:$0xff]  }
  0xf9   :  { %1947 = vmatprep.subr.bf16.mxu1 %v3300_v11  ;;  %2499 = vmatpush1.bf16.msra.mxu0 %v3391_v21  ;;  %v3358_v11 = vld [vmem:[#allocation7 + $0x688] ss:$16 sps:$4 sm:$0xff]  }
  0xfa   :  { %2500 = vmatprep.subr.bf16.mxu0 %v3396_v12  ;;  %v3361_v21 = vld [vmem:[#allocation7 + $0x6a8] ss:$16 sps:$4 sm:$0xff]  }
  0xfb   :  { %1937 = vmatmul.mubr.bf16.vlgmr.msra.gmra.mrb[4].mxu1 %v3668_v37  ;;  %v3405_v37 = vld [vmem:[#allocation9 + $0xb4] ss:$8 sps:$4 sm:$0xff]  }
  0xfc   :  { %1948 = vmatpush1.bf16.msra.mxu1 %v3298_v13  ;;  %1979 = vmatprep.mubr.bf16.mxu1 %v3688_v26  ;;  %v3403_v26 = vld [vmem:[#allocation9 + $0xb0] ss:$8 sps:$4 sm:$0xff]  }
  0xfd   :  { %1949 = vmatprep.subr.bf16.mxu1 %v3303_v14  ;;  %2501 = vmatpush1.bf16.msra.mxu0 %v3394_v15  ;;  %v3364_v15 = vld [vmem:[#allocation7 + $0x6c8] ss:$16 sps:$4 sm:$0xff]  }
  0xfe   :  { %2502 = vmatprep.subr.bf16.mxu0 %v3399_v16 }
 0x100   :  { %1950 = vmatpush1.bf16.msra.mxu1 %v3301_v17  ;;  %v3369_v17 = vld [vmem:[#allocation7 + $0x6ec] ss:$16 sps:$4 sm:$0xff]  }
 0x101   :  { %1951 = vmatprep.subr.bf16.mxu1 %v3306_v18  ;;  %2503 = vmatpush1.bf16.msra.mxu0 %v3397_v19  ;;  %v3367_v18 = vld [vmem:[#allocation7 + $0x6e8] ss:$16 sps:$4 sm:$0xff]   ;;  %v78_v19 = vsub.s32 0, %v3650_v47 }
 0x102   :  { %2504 = vmatprep.subr.bf16.mxu0 %v3402_v20  ;;  %v3726_v20 = vld [vmem:[%s3767_s2] sm:$0xf] }
 0x104   :  { %1952 = vmatpush1.bf16.msra.mxu1 %v3304_v22  ;;  %v82_v22 = vsub.s32 1, %v3650_v47 }
 0x105   :  { %1953 = vmatprep.subr.bf16.mxu1 %v3309_v23  ;;  %2505 = vmatpush1.bf16.msra.mxu0 %v3400_v24  ;;  %v79_v23 = vrot.slane %v3726_v20, %v78_v19 }
 0x106   :  { %2506 = vmatprep.subr.bf16.mxu0 %v3405_v37  ;;  %v83_v37 = vrot.slane %v3726_v20, %v82_v22 }
 0x108   :  { %1954 = vmatpush1.bf16.msra.mxu1 %v3307_v25 }
 0x109   :  { %1955 = vmatprep.subr.bf16.mxu1 %v3312_v27  ;;  %2507 = vmatpush1.bf16.msra.mxu0 %v3403_v26 }
 0x10a   :  { %2508 = vmatprep.subr.bf16.mxu0 %v3408_v28 }
 0x10c   :  { %1956 = vmatpush1.bf16.msra.mxu1 %v3310_v29 }
 0x10d   :  { %1957 = vmatprep.subr.bf16.mxu1 %v3315_v30  ;;  %2509 = vmatpush1.bf16.msra.mxu0 %v3406_v39 }
 0x10e   :  { %2510 = vmatprep.subr.bf16.mxu0 %v3411_v54  ;;  %v3427_v54 = vld [vmem:[#allocation9 + $0x130] ss:$8 sps:$4 sm:$0xff]  }
 0x110   :  { %1958 = vmatpush1.bf16.msra.mxu1 %v3313_v31 }
 0x111   :  { %1959 = vmatprep.subr.bf16.mxu1 %v3318_v32  ;;  %2511 = vmatpush1.bf16.msra.mxu0 %v3409_v56  ;;  %v3432_v56 = vld [vmem:[#allocation9 + $0x144] ss:$8 sps:$4 sm:$0xff]  }
 0x112   :  { %2512 = vmatprep.subr.bf16.mxu0 %v3414_v60  ;;  %v3433_v60 = vld [vmem:[#allocation9 + $0x150] ss:$8 sps:$4 sm:$0xff]  }
 0x114   :  { %1960 = vmatpush1.bf16.msra.mxu1 %v3316_v33 }
 0x115   :  { %1961 = vmatprep.subr.bf16.mxu1 %v3321_v35  ;;  %2513 = vmatpush1.bf16.msra.mxu0 %v3412_v61  ;;  %v3438_v61 = vld [vmem:[#allocation9 + $0x164] ss:$8 sps:$4 sm:$0xff]  }
 0x116   :  { %2514 = vmatprep.subr.bf16.mxu0 %v3417_v0  ;;  %v3439_v0 = vld [vmem:[#allocation9 + $0x170] ss:$8 sps:$4 sm:$0xff]  }
 0x118   :  { %1962 = vmatpush1.bf16.msra.mxu1 %v3319_v36 }
 0x119   :  { %1963 = vmatprep.subr.bf16.mxu1 %v3324_v38  ;;  %2515 = vmatpush1.bf16.msra.mxu0 %v3415_v1  ;;  %v3444_v1 = vld [vmem:[#allocation9 + $0x184] ss:$8 sps:$4 sm:$0xff]  }
 0x11a   :  { %2527 = vmatprep.subr.bf16.mxu0 %v3420_v34  ;;  %v3450_v34 = vld [vmem:[#allocation9 + $0x1a4] ss:$8 sps:$4 sm:$0xff]  }
 0x11c   :  { %1964 = vmatpush1.bf16.msra.mxu1 %v3322_v40 }
 0x11d   :  { %1965 = vmatprep.subr.bf16.mxu1 %v3327_v42 }
 0x120   :  { %1966 = vmatpush1.bf16.msra.mxu1 %v3325_v43 }
 0x121   :  { %1967 = vmatprep.subr.bf16.mxu1 %v3330_v44 }
 0x124   :  { %1968 = vmatpush1.bf16.msra.mxu1 %v3328_v45 }
 0x125   :  { %1969 = vmatprep.subr.bf16.mxu1 %v3333_v46 }
 0x128   :  { %1970 = vmatpush1.bf16.msra.mxu1 %v3331_v48  ;;  %v3418_v48 = vld [vmem:[#allocation9 + $0x100] ss:$8 sps:$4 sm:$0xff]  }
 0x129   :  { %1971 = vmatprep.subr.bf16.mxu1 %v3336_v49  ;;  %v3423_v49 = vld [vmem:[#allocation9 + $0x114] ss:$8 sps:$4 sm:$0xff]  }
 0x12c   :  { %1972 = vmatpush1.bf16.msra.mxu1 %v3334_v50  ;;  %v3421_v50 = vld [vmem:[#allocation9 + $0x110] ss:$8 sps:$4 sm:$0xff]  }
 0x12d   :  { %1973 = vmatprep.subr.bf16.mxu1 %v3339_v51  ;;  %v3426_v51 = vld [vmem:[#allocation9 + $0x124] ss:$8 sps:$4 sm:$0xff]  }
 0x130   :  { %1974 = vmatpush1.bf16.msra.mxu1 %v3337_v52  ;;  %v3424_v52 = vld [vmem:[#allocation9 + $0x120] ss:$8 sps:$4 sm:$0xff]  }
 0x131   :  { %1975 = vmatprep.subr.bf16.mxu1 %v3342_v53  ;;  %v3429_v53 = vld [vmem:[#allocation9 + $0x134] ss:$8 sps:$4 sm:$0xff]  }
 0x134   :  { %1976 = vmatpush1.bf16.msra.mxu1 %v3340_v57  ;;  %v3430_v57 = vld [vmem:[#allocation9 + $0x140] ss:$8 sps:$4 sm:$0xff]  }
 0x135   :  { %1977 = vmatprep.subr.bf16.mxu1 %v3345_v58  ;;  %v3435_v58 = vld [vmem:[#allocation9 + $0x154] ss:$8 sps:$4 sm:$0xff]  }
 0x138   :  { %1978 = vmatpush1.bf16.msra.mxu1 %v3343_v62  ;;  %v3436_v62 = vld [vmem:[#allocation9 + $0x160] ss:$8 sps:$4 sm:$0xff]  }
 0x139   :  { %1990 = vmatprep.subr.bf16.mxu1 %v3348_v63  ;;  %v3441_v63 = vld [vmem:[#allocation9 + $0x174] ss:$8 sps:$4 sm:$0xff]  }
 0x13b   :  { %1980 = vmatmul.mubr.bf16.vlgmr.msra.gmra.mrb[4].mxu1 %v3695_v59  ;;  %v3363_v59 = vld [vmem:[#allocation7 + $0x6ac] ss:$16 sps:$4 sm:$0xff]  }
 0x13c   :  { %1991 = vmatpush1.bf16.msra.mxu1 %v3346_v2  ;;  %2022 = vmatprep.mubr.bf16.mxu1 %v3570_v3  ;;  %v3366_v3 = vld [vmem:[#allocation7 + $0x6cc] ss:$16 sps:$4 sm:$0xff]   ;;  %v3442_v2 = vld [vmem:[#allocation9 + $0x180] ss:$8 sps:$4 sm:$0xff]  }
 0x13d   :  { %1992 = vmatprep.subr.bf16.mxu1 %v3351_v4  ;;  %v3447_v4 = vld [vmem:[#allocation9 + $0x194] ss:$8 sps:$4 sm:$0xff]  }
 0x140   :  { %1993 = vmatpush1.bf16.msra.mxu1 %v3349_v5  ;;  %v3445_v5 = vld [vmem:[#allocation9 + $0x190] ss:$8 sps:$4 sm:$0xff]  }
 0x141   :  { %1994 = vmatprep.subr.bf16.mxu1 %v3354_v6  ;;  %v3448_v6 = vld [vmem:[#allocation9 + $0x1a0] ss:$8 sps:$4 sm:$0xff]  }
 0x144   :  { %1995 = vmatpush1.bf16.msra.mxu1 %v3352_v7  ;;  %v3453_v7 = vld [vmem:[#allocation9 + $0x1b4] ss:$8 sps:$4 sm:$0xff]  }
 0x145   :  { %1996 = vmatprep.subr.bf16.mxu1 %v3357_v8  ;;  %v3451_v8 = vld [vmem:[#allocation9 + $0x1b0] ss:$8 sps:$4 sm:$0xff]  }
 0x148   :  { %1997 = vmatpush1.bf16.msra.mxu1 %v3355_v9  ;;  %v3456_v9 = vld [vmem:[#allocation9 + $0x1c4] ss:$8 sps:$4 sm:$0xff]  }
 0x149   :  { %1998 = vmatprep.subr.bf16.mxu1 %v3360_v10  ;;  %v3454_v10 = vld [vmem:[#allocation9 + $0x1c0] ss:$8 sps:$4 sm:$0xff]  }
 0x14c   :  { %1999 = vmatpush1.bf16.msra.mxu1 %v3358_v11  ;;  %v3459_v11 = vld [vmem:[#allocation9 + $0x1d4] ss:$8 sps:$4 sm:$0xff]  }
 0x14d   :  { %2000 = vmatprep.subr.bf16.mxu1 %v3363_v59  ;;  %v3457_v59 = vld [vmem:[#allocation9 + $0x1d0] ss:$8 sps:$4 sm:$0xff]  }
 0x14e   :  { %v1723_v12 = vpop.f32.mrb[0].mxu1 }
 0x14f   :  { %v1725_v13 = vpop.f32.mrb[1].mxu1 }
 0x150   :  { %v1727_v14 = vpop.f32.mrb[2].mxu1  ;;  %2001 = vmatpush1.bf16.msra.mxu1 %v3361_v21  ;;  %v3462_v21 = vld [vmem:[#allocation9 + $0x1e4] ss:$8 sps:$4 sm:$0xff]  }
 0x151   :  { %v1729_v16 = vpop.f32.mrb[3].mxu1  ;;  %2002 = vmatprep.subr.bf16.mxu1 %v3366_v3  ;;  %v3460_v3 = vld [vmem:[#allocation9 + $0x1e0] ss:$8 sps:$4 sm:$0xff]  }
 0x154   :  { %2003 = vmatpush1.bf16.msra.mxu1 %v3364_v15  ;;  %v90_v15 = vsub.s32 3, %v3650_v47 }
 0x155   :  { %2004 = vmatprep.subr.bf16.mxu1 %v3369_v17 }
 0x156   :  { %v91_v17 = vrot.slane %v3726_v20, %v90_v15 }
 0x158   :  { %2005 = vmatpush1.bf16.msra.mxu1 %v3367_v18 }
 0x15b   :  { %2899 = vmatmul.mubr.msk.bf16.vlgmr.msra.gmra.mrb[4].mxu1 %vm3706_vm1, %v3710_v41 }
 0x1af   :  { %v1852_v24 = vpop.f32.mrb[0].mxu0 }
 0x1b0   :  { %v2965_v55 = vadd.f32 %v1852_v24, %v1723_v12  ;;  %v1854_v41 = vpop.f32.mrb[1].mxu0  ;;  %v3465_v12 = vld [vmem:[#allocation9 + $0x1f4] ss:$8 sps:$4 sm:$0xff]  }
 0x1b1   :  { %v2966_v25 = vadd.f32 %v1854_v41, %v1725_v13  ;;  %v1856_v27 = vpop.f32.mrb[2].mxu0  ;;  %v3463_v13 = vld [vmem:[#allocation9 + $0x1f0] ss:$8 sps:$4 sm:$0xff]  }
 0x1b2   :  { %v2033_v26 = vadd.f32 %v2965_v55, %v79_v23  ;;  %v2967_v28 = vadd.f32 %v1856_v27, %v1727_v14  ;;  %v1858_v29 = vpop.f32.mrb[3].mxu0  ;;  %v86_v14 = vsub.s32 2, %v3650_v47 }
 0x1b3   :  { %v2034_v30 = vadd.f32 %v2966_v25, %v83_v37  ;;  %v2968_v39 = vadd.f32 %v1858_v29, %v1729_v16 }
 0x1b4   :  { %v2068_v31 = vmul.f32 0.2, %v2033_v26  ;;  %v2037_v32 = vadd.f32 %v2967_v28, %v79_v23  ;;  %vm2060_vm2 = vcmp.gt.f32.partialorder %v2033_v26, 0.0  ;;  %v87_v16 = vrot.slane %v3726_v20, %v86_v14 }
 0x1b5   :  { %v2069_v33 = vmul.f32 0.2, %v2034_v30  ;;  %v2038_v35 = vadd.f32 %v2968_v39, %v83_v37  ;;  %vm2061_vm3 = vcmp.gt.f32.partialorder %v2034_v30, 0.0 }
 0x1b6   :  { %vm2064_vm4 = vcmp.gt.f32.partialorder %v2037_v32, 0.0  ;;  %v2072_v36 = vmul.f32 0.2, %v2037_v32  ;;  %v2076_v40 = vsel %vm2060_vm2, %v2033_v26, %v2068_v31 }
 0x1b7   :  { %vm2065_vm5 = vcmp.gt.f32.partialorder %v2038_v35, 0.0  ;;  %v2073_v38 = vmul.f32 0.2, %v2038_v35  ;;  %v2077_v43 = vsel %vm2061_vm3, %v2034_v30, %v2069_v33 }
 0x1b8   :  { %v2080_v42 = vsel %vm2064_vm4, %v2037_v32, %v2072_v36  ;;  %v3571_v36 = vmov 1966171168  }
 0x1b9   :  { %v2081_v44 = vsel %vm2065_vm5, %v2038_v35, %v2073_v38  ;;  %v2084_v45 = vpack.c.bf16 %v2080_v42, %v2076_v40  ;;  %v2597_v38 = vunpack.c.l.s4 %v3571_v36  ;;  %v2964_v40 = vld.sshfl [vmem:[%s3770_s5] sm:$0x11 pattern:$0x75316420] }
 0x1ba   :  { %v2085_v46 = vpack.c.bf16 %v2081_v44, %v2077_v43  ;;  %v2595_v43 = vcombine.high %v2964_v40, %v2964_v40 }
 0x1bb   :  { %v2598_v42 = vunpack.c.0.s8 %v2597_v38 }
 0x1bc   :  { %2516 = vmatprep.mubr.bf16.mxu0 %v2085_v46 }
 0x1bd   :  { %2517 = vmatmul.mubr.bf16.vlgmr.msra.gmra.mrb[4].mxu0 %v2084_v45  ;;  %v2601_v44 = vsub.s32 %v2598_v42, %v3650_v47 }
 0x1be   :  { %2528 = vmatpush1.bf16.msra.mxu0 %v3418_v48  ;;  %v2152_v48 = vld [vmem:[%s3769_s4] sm:$0x3] }
 0x1bf   :  { %2529 = vmatprep.subr.bf16.mxu0 %v3423_v49  ;;  %v2609_v45 = vrot.slane %v2595_v43, %v2601_v44  ;;  %v2602_v46 = vrot.slane %v2964_v40, %v2601_v44  ;;  %v2157_v49 = vrot.slane %v2152_v48, %v78_v19 }
 0x1c1   :  { %2644 = vmatprep.mubr.bf16.mxu1 %v2609_v45 }
 0x1c2   :  { %2530 = vmatpush1.bf16.msra.mxu0 %v3421_v50  ;;  %v2161_v50 = vrot.slane %v2152_v48, %v82_v22 }
 0x1c3   :  { %2531 = vmatprep.subr.bf16.mxu0 %v3426_v51 }
 0x1c6   :  { %2532 = vmatpush1.bf16.msra.mxu0 %v3424_v52 }
 0x1c7   :  { %2533 = vmatprep.subr.bf16.mxu0 %v3429_v53 }
 0x1ca   :  { %2534 = vmatpush1.bf16.msra.mxu0 %v3427_v54 }
 0x1cb   :  { %2535 = vmatprep.subr.bf16.mxu0 %v3432_v56 }
 0x1ce   :  { %2536 = vmatpush1.bf16.msra.mxu0 %v3430_v57 }
 0x1cf   :  { %2537 = vmatprep.subr.bf16.mxu0 %v3435_v58 }
 0x1d2   :  { %2538 = vmatpush1.bf16.msra.mxu0 %v3433_v60 }
 0x1d3   :  { %2539 = vmatprep.subr.bf16.mxu0 %v3438_v61 }
 0x1d6   :  { %2540 = vmatpush1.bf16.msra.mxu0 %v3436_v62 }
 0x1d7   :  { %2541 = vmatprep.subr.bf16.mxu0 %v3441_v63 }
 0x1da   :  { %2542 = vmatpush1.bf16.msra.mxu0 %v3439_v0 }
 0x1db   :  { %2543 = vmatprep.subr.bf16.mxu0 %v3444_v1 }
 0x1de   :  { %2544 = vmatpush1.bf16.msra.mxu0 %v3442_v2 }
 0x1df   :  { %2545 = vmatprep.subr.bf16.mxu0 %v3447_v4 }
 0x1e2   :  { %2546 = vmatpush1.bf16.msra.mxu0 %v3445_v5  ;;  %v2586_v5 = vstv %s3771_s6 }
 0x1e3   :  { %2547 = vmatprep.subr.bf16.mxu0 %v3450_v34 }
 0x1e6   :  { %2548 = vmatpush1.bf16.msra.mxu0 %v3448_v6 }
 0x1e7   :  { %2549 = vmatprep.subr.bf16.mxu0 %v3453_v7 }
 0x1ea   :  { %2550 = vmatpush1.bf16.msra.mxu0 %v3451_v8 }
 0x1eb   :  { %2551 = vmatprep.subr.bf16.mxu0 %v3456_v9 }
 0x1ee   :  { %2552 = vmatpush1.bf16.msra.mxu0 %v3454_v10 }
 0x1ef   :  { %2553 = vmatprep.subr.bf16.mxu0 %v3459_v11 }
 0x1f2   :  { %2554 = vmatpush1.bf16.msra.mxu0 %v3457_v59 }
 0x1f3   :  { %2555 = vmatprep.subr.bf16.mxu0 %v3462_v21 }
 0x1f6   :  { %2556 = vmatpush1.bf16.msra.mxu0 %v3460_v3 }
 0x1f7   :  { %2557 = vmatprep.subr.bf16.mxu0 %v3465_v12 }
 0x1fa   :  { %2558 = vmatpush1.bf16.msra.mxu0 %v3463_v13 }
 0x22e   :  { %v2024_v18 = vpop.f32.mrb[4].mxu1 }
 0x22f   :  { %v2035_v23 = vadd.f32 %v2024_v18, %v87_v16  ;;  %v2026_v24 = vpop.f32.mrb[5].mxu1 }
 0x230   :  { %v2036_v37 = vadd.f32 %v2026_v24, %v91_v17  ;;  %v2028_v55 = vpop.f32.mrb[6].mxu1 }
 0x231   :  { %v2070_v41 = vmul.f32 0.2, %v2035_v23  ;;  %v2039_v25 = vadd.f32 %v2028_v55, %v87_v16  ;;  %v2030_v27 = vpop.f32.mrb[7].mxu1  ;;  %vm2062_vm6 = vcmp.gt.f32.partialorder %v2035_v23, 0.0 }
 0x232   :  { %v2071_v26 = vmul.f32 0.2, %v2036_v37  ;;  %v2040_v28 = vadd.f32 %v2030_v27, %v91_v17  ;;  %vm2063_vm7 = vcmp.gt.f32.partialorder %v2036_v37, 0.0 }
 0x233   :  { %vm2066_vm8 = vcmp.gt.f32.partialorder %v2039_v25, 0.0  ;;  %v2074_v29 = vmul.f32 0.2, %v2039_v25  ;;  %v2078_v39 = vsel %vm2062_vm6, %v2035_v23, %v2070_v41 }
 0x234   :  { %vm2067_vm9 = vcmp.gt.f32.partialorder %v2040_v28, 0.0  ;;  %v2075_v30 = vmul.f32 0.2, %v2040_v28  ;;  %v2079_v20 = vsel %vm2063_vm7, %v2036_v37, %v2071_v26 }
 0x235   :  { %v2082_v31 = vsel %vm2066_vm8, %v2039_v25, %v2074_v29 }
 0x236   :  { %v2086_v32 = vpack.c.bf16 %v2082_v31, %v2078_v39  ;;  %v2083_v33 = vsel %vm2067_vm9, %v2040_v28, %v2075_v30 }
 0x237   :  { %v2087_v35 = vpack.c.bf16 %v2083_v33, %v2079_v20 }
 0x239   :  { %2559 = vmatprep.mubr.bf16.mxu0 %v2087_v35 }
 0x23a   :  { %2560 = vmatmul.mubr.bf16.vlgmr.msra.gmra.mrb[4].mxu0 %v2086_v32 }
 0x30d   :  { %v2561_v51 = vpop.f32.mrb[4].mxu0 }
 0x30e   :  { %v2969_v52 = vadd.f32 %v2561_v51, %v2157_v49  ;;  %v2563_v53 = vpop.f32.mrb[5].mxu0 }
 0x30f   :  { %v2970_v54 = vadd.f32 %v2563_v53, %v2161_v50  ;;  %v2565_v56 = vpop.f32.mrb[6].mxu0 }
 0x310   :  { %v2574_v57 = vmul.f32 0.2, %v2969_v52  ;;  %v2971_v58 = vadd.f32 %v2565_v56, %v2157_v49  ;;  %v2567_v60 = vpop.f32.mrb[7].mxu0  ;;  %vm2570_vm10 = vcmp.gt.f32.partialorder %v2969_v52, 0.0 }
 0x311   :  { %v2575_v61 = vmul.f32 0.2, %v2970_v54  ;;  %v2972_v62 = vadd.f32 %v2567_v60, %v2161_v50  ;;  %vm2571_vm11 = vcmp.gt.f32.partialorder %v2970_v54, 0.0 }
 0x312   :  { %vm2572_vm12 = vcmp.gt.f32.partialorder %v2971_v58, 0.0  ;;  %v2576_v63 = vmul.f32 0.2, %v2971_v58  ;;  %v2578_v19 = vsel %vm2570_vm10, %v2969_v52, %v2574_v57 }
 0x313   :  { %vm2573_vm13 = vcmp.gt.f32.partialorder %v2972_v62, 0.0  ;;  %v2577_v0 = vmul.f32 0.2, %v2972_v62  ;;  %v2579_v22 = vsel %vm2571_vm11, %v2970_v54, %v2575_v61 }
 0x314   :  { %v2580_v1 = vsel %vm2572_vm12, %v2971_v58, %v2576_v63 }
 0x315   :  { %v2583_v47 = vpack.c.bf16 %v2580_v1, %v2578_v19  ;;  %v2581_v2 = vsel %vm2573_vm13, %v2972_v62, %v2577_v0 }
 0x316   :  { %v2584_v4 = vpack.c.bf16 %v2581_v2, %v2579_v22 }
 0x318   :  { %2612 = vmatprep.subr.bf16.mxu1 %v2584_v4 }
 0x319   :  { %2613 = vmatpush1.bf16.xpose.msra.mxu1 %v2583_v47 }
 0x320   :  { %2645 = vmatmul.mubr.bf16.vlgmr.msra.gmra.mrb[8].mxu1 %v2602_v46 }
 0x3f3   :  { %v2646_v34 = vpop.f32.mrb[8].mxu1 }
 0x3f4   :  { %v2647_v6 = vadd.f32 %v2646_v34, %v2586_v5  ;;  %v2648_v7 = vpop.f32.mrb[9].mxu1 }
 0x3f5   :  { %v2649_v8 = vpop.f32.mrb[10].mxu1 }
 0x3f6   :  { %v2650_v9 = vpop.f32.mrb[11].mxu1  ;;  %2653 = vst.msk [vmem:[#allocation10] sm:$0x1] %vm2652_vm14, %v2647_v6 }
 0x3f7   :  { %3543 = shalt.err (!%p3540_p0)
}
 0x3f8   :  { %s3544_s27 = scalar_lea.hbm %s3772_s7, 16 }
 0x3f9   :  { %p3545_p1 = scmp.ne.s32.totalorder %s3772_s7, %s3544_s27  ;;  %p3548_p2 = scmp.lt.u32.totalorder %s3544_s27, %s3772_s7 }
 0x3fb   :  { %p3550_p3 = pnand %p3548_p2, %p3545_p1 }
 0x3fd   :  { %3553 = shalt.err (!%p3550_p3)
}
 0x3fe   :  { %2663 = dma.vmem_to_hbm [thread:$0]  %s2661_s24, 16, %s3772_s7, [#allocation6]  }
 0x3ff   :  { %3558 = dma.done.wait [#allocation6], 16  }
 0x400   :  { %3559 = vsyncadd [#allocation6], 4294967280 }
 0x401   :  { %2667 = vsyncpa [#allocation5], 1 }
 0x402   :  { %2668 = vsyncpa [#allocation8], 1 }
 0x403   :  { %2669 = vsyncpa [#allocation6], 1 }

</bundles_post_ra>
